<compile_context>
chip_gen: v7x
topology: tpu7x:2x2x1
jax: 0.10.0
libtpu: 0.0.40
codegen_flags: <defaults>
</compile_context>

<pallas_src>
import functools

import jax
import jax.numpy as jnp
from jax.experimental import pallas as pl
from jax.experimental.pallas import tpu as pltpu


_VMEM = pl.BlockSpec(memory_space=pltpu.MemorySpace.VMEM)


# ----------------------------- Pallas kernels ------------------------------

def _mm_bias_relu_kernel(x_ref, w_ref, b_ref, o_ref):
    # fused matmul + folded-BN bias + ReLU (bf16 MXU, f32 accumulate)
    acc = jnp.dot(x_ref[...].astype(jnp.bfloat16), w_ref[...],
                  preferred_element_type=jnp.float32) + b_ref[...]
    o_ref[...] = jnp.maximum(acc, 0.0)


def _layer_kernel(x_ref, m_ref, w1_ref, b1_ref, w2_ref, b2_ref, w3_ref, b3_ref,
                  o_ref, act_ref, *, H, W):
    # One grid step == one stride-1 identity-residual bottleneck:
    #   conv1(1x1)+BN+ReLU -> conv2(3x3,p1: 9 shifted-window matmuls)
    #   -> conv3(1x1)+BN + residual + ReLU.
    # The activation ring ((H+2)*(W+2), C) is carried across grid steps in the
    # VMEM scratch; stacked per-block weights stream in via BlockSpec
    # double-buffering.  The HBM output is written only at the last step.
    i = pl.program_id(0)
    Wp = W + 2
    L2 = (H - 1) * Wp + W          # conv2/conv3 computed in a top-left window
    base = Wp + 1                  # flat offset of image pixel (0,0)

    @pl.when(i == 0)
    def _():
        act_ref[...] = x_ref[...]

    x = act_ref[...]               # (Lp, C) f32, zero padding ring
    m = m_ref[...]                 # (Lp, 1)  f32, 1 = interior pixel

    # conv1 (1x1) + folded BN + ReLU; re-zero the ring; single bf16 cast.
    h1 = jnp.dot(x.astype(jnp.bfloat16), w1_ref[...],
                 preferred_element_type=jnp.float32) + b1_ref[...]
    h1 = (jnp.maximum(h1, 0.0) * m).astype(jnp.bfloat16)        # (Lp, P)

    # conv2 (3x3, stride 1, pad 1): accumulate 9 shifted-slice matmuls.
    acc = jnp.dot(h1[0:L2, :], w2_ref[0], preferred_element_type=jnp.float32)
    for t in range(1, 9):
        off = (t // 3) * Wp + (t % 3)
        acc = acc + jnp.dot(h1[off:off + L2, :], w2_ref[t],
                            preferred_element_type=jnp.float32)
    h2 = jnp.maximum(acc + b2_ref[...], 0.0).astype(jnp.bfloat16)  # (L2, P)

    # conv3 (1x1) + folded BN + identity residual + ReLU.
    out = jnp.dot(h2, w3_ref[...], preferred_element_type=jnp.float32) + b3_ref[...]
    out = jnp.maximum(out + x[base:base + L2, :], 0.0) * m[base:base + L2, :]

    # Write back in the centered zero-ring layout for the next block.
    act_ref[...] = jnp.zeros(act_ref.shape, act_ref.dtype)
    act_ref[pl.ds(base, L2), :] = out

    @pl.when(i == pl.num_programs(0) - 1)
    def _():
        o_ref[...] = act_ref[...]


def _bottleneck_ds_kernel(x_ref, m_ref, w1_ref, b1_ref, w2_ref, b2_ref,
                          w3_ref, b3_ref, wds_ref, bds_ref, o_ref, *, H, W):
    # Stride-1 bottleneck WITH a 1x1 downsample on the residual (layer1[0]),
    # fully fused in one call.
    Wp = W + 2
    L2 = (H - 1) * Wp + W
    base = Wp + 1

    x = x_ref[...]
    m = m_ref[...]

    h1 = jnp.dot(x.astype(jnp.bfloat16), w1_ref[...],
                 preferred_element_type=jnp.float32) + b1_ref[...]
    h1 = (jnp.maximum(h1, 0.0) * m).astype(jnp.bfloat16)

    acc = jnp.dot(h1[0:L2, :], w2_ref[0], preferred_element_type=jnp.float32)
    for t in range(1, 9):
        off = (t // 3) * Wp + (t % 3)
        acc = acc + jnp.dot(h1[off:off + L2, :], w2_ref[t],
                            preferred_element_type=jnp.float32)
    h2 = jnp.maximum(acc + b2_ref[...], 0.0).astype(jnp.bfloat16)

    out = jnp.dot(h2, w3_ref[...], preferred_element_type=jnp.float32) + b3_ref[...]
    iden = jnp.dot(x[base:base + L2, :].astype(jnp.bfloat16), wds_ref[...],
                   preferred_element_type=jnp.float32) + bds_ref[...]
    out = jnp.maximum(out + iden, 0.0) * m[base:base + L2, :]

    o_ref[...] = jnp.zeros(o_ref.shape, o_ref.dtype)
    o_ref[pl.ds(base, L2), :] = out


def _bottleneck_s2_tail_kernel(p_ref, xs_ref, w2_ref, b2_ref, w3_ref, b3_ref,
                               wds_ref, bds_ref, o_ref):
    # Tail of a stride-2 bottleneck: conv2(3x3,s2) via pre-built patches,
    # conv3(1x1), downsample(1x1,s2), residual, ReLU — all fused.
    h2 = jnp.dot(p_ref[...], w2_ref[...],
                 preferred_element_type=jnp.float32) + b2_ref[...]
    h2 = jnp.maximum(h2, 0.0).astype(jnp.bfloat16)
    out = jnp.dot(h2, w3_ref[...], preferred_element_type=jnp.float32) + b3_ref[...]
    iden = jnp.dot(xs_ref[...].astype(jnp.bfloat16), wds_ref[...],
                   preferred_element_type=jnp.float32) + bds_ref[...]
    o_ref[...] = jnp.maximum(out + iden, 0.0)


# ------------------------------ Pallas wrappers ------------------------------

def _mm_bias_relu(x, w, b):
    M, N = x.shape[0], w.shape[1]
    return pl.pallas_call(
        _mm_bias_relu_kernel,
        out_shape=jax.ShapeDtypeStruct((M, N), jnp.float32),
        in_specs=[_VMEM, _VMEM, _VMEM],
        out_specs=_VMEM,
    )(x, w, b)


@functools.partial(jax.jit, static_argnames=("H", "W"))
def fused_layer(x_pad, mask, stk, *, H, W):
    # All stride-1 identity-residual bottlenecks of one layer in ONE gridded
    # pallas_call.  Per-block weights stream via BlockSpec double-buffering;
    # the activation ring is carried in a VMEM scratch across grid steps.
    n, Cin, P = stk["w1"].shape
    Cout = stk["w3"].shape[2]
    Lp = (H + 2) * (W + 2)
    L2 = (H - 1) * (W + 2) + W

    wbytes = sum(int(v.size) * v.dtype.itemsize for v in stk.values())
    abytes = (2 * Lp * Cout + Lp) * 4
    flops = 2 * n * (Lp * Cin * P + 9 * L2 * P * P + L2 * P * Cout)

    grid_spec = pltpu.PrefetchScalarGridSpec(
        num_scalar_prefetch=0,
        grid=(n,),
        in_specs=[
            pl.BlockSpec((Lp, Cin), lambda i: (0, 0)),            # activation (read @ step 0)
            pl.BlockSpec((Lp, 1), lambda i: (0, 0)),              # interior mask
            pl.BlockSpec((None, Cin, P), lambda i: (i, 0, 0)),    # w1  per block
            pl.BlockSpec((None, 1, P), lambda i: (i, 0, 0)),      # b1
            pl.BlockSpec((None, 9, P, P), lambda i: (i, 0, 0, 0)),  # w2 taps
            pl.BlockSpec((None, 1, P), lambda i: (i, 0, 0)),      # b2
            pl.BlockSpec((None, P, Cout), lambda i: (i, 0, 0)),   # w3
            pl.BlockSpec((None, 1, Cout), lambda i: (i, 0, 0)),   # b3
        ],
        out_specs=pl.BlockSpec((Lp, Cout), lambda i: (0, 0)),
        scratch_shapes=[pltpu.VMEM((Lp, Cout), jnp.float32)],
    )
    return pl.pallas_call(
        functools.partial(_layer_kernel, H=H, W=W),
        out_shape=jax.ShapeDtypeStruct((Lp, Cout), jnp.float32),
        grid_spec=grid_spec,
        compiler_params=pltpu.CompilerParams(
            dimension_semantics=("arbitrary",)),   # serial residual chain
        cost_estimate=pl.CostEstimate(flops=flops, transcendentals=0,
                                      bytes_accessed=wbytes + abytes),
    )(x_pad, mask, stk["w1"], stk["b1"], stk["w2"], stk["b2"],
      stk["w3"], stk["b3"])


@functools.partial(jax.jit, static_argnames=("H", "W"))
def fused_bottleneck_ds(x_pad, mask, p, *, H, W):
    # layer1[0]: stride-1 bottleneck with downsample residual, one fused call.
    Lp = (H + 2) * (W + 2)
    Cout = p["w3"].shape[1]
    args = [x_pad, mask, p["w1"], p["b1"], p["w2"], p["b2"], p["w3"], p["b3"],
            p["wds"], p["bds"]]
    return pl.pallas_call(
        functools.partial(_bottleneck_ds_kernel, H=H, W=W),
        out_shape=jax.ShapeDtypeStruct((Lp, Cout), jnp.float32),
        in_specs=[_VMEM] * len(args),
        out_specs=_VMEM,
    )(*args)


@functools.partial(jax.jit, static_argnames=("H", "W"))
def stride2_bottleneck(x_pad, p, *, H, W):
    # First block of layer2 / layer3 (stride-2 conv2 + stride-2 downsample):
    # spatial striding handled with JAX strided views; matmuls in two fused
    # Pallas calls.
    Wp = W + 2
    Cin = x_pad.shape[1]
    P = p["w1"].shape[1]
    Cout = p["w3"].shape[1]
    x3 = x_pad.reshape(H + 2, Wp, Cin)
    x_int = x3[1:H + 1, 1:W + 1, :].reshape(H * W, Cin)

    h1 = _mm_bias_relu(x_int.astype(jnp.bfloat16), p["w1"], p["b1"])   # (H*W, P)

    H2, W2 = H // 2, W // 2
    h1p = jnp.pad(h1.reshape(H, W, P), ((1, 1), (1, 1), (0, 0)))
    taps = [h1p[i:i + 2 * H2:2, j:j + 2 * W2:2, :]
            for i in range(3) for j in range(3)]
    patches = jnp.stack(taps, axis=2).reshape(H2 * W2, 9 * P).astype(jnp.bfloat16)
    xs = x3[1:H + 1:2, 1:W + 1:2, :].reshape(H2 * W2, Cin)

    out = pl.pallas_call(
        _bottleneck_s2_tail_kernel,
        out_shape=jax.ShapeDtypeStruct((H2 * W2, Cout), jnp.float32),
        in_specs=[_VMEM] * 8,
        out_specs=_VMEM,
    )(patches, xs, p["w2"], p["b2"], p["w3"], p["b3"], p["wds"], p["bds"])

    out_pad = jnp.pad(out.reshape(H2, W2, Cout), ((1, 1), (1, 1), (0, 0)))
    return out_pad.reshape((H2 + 2) * (W2 + 2), Cout)


@jax.jit
def stem_forward(img_hwc, p):
    # conv1(7x7,s2,p3)+bn1+ReLU with ToTensor/Normalize folded in, then
    # MaxPool2d(3,s2,p1).  Matmul in Pallas; pooling is a trivial fused XLA
    # 9-way max (post-ReLU so zero padding is exact).
    x = img_hwc.astype(jnp.float32) - p["shift"]          # mean shift (raw scale)
    Hi, Wi, _ = x.shape
    Ho, Wo = (Hi - 1) // 2 + 1, (Wi - 1) // 2 + 1
    xp = jnp.pad(x, ((3, 3), (3, 3), (0, 0)))
    taps = [xp[i:i + 2 * Ho:2, j:j + 2 * Wo:2, :]
            for i in range(7) for j in range(7)]
    patches = jnp.stack(taps, axis=2).reshape(Ho * Wo, 49 * 3)
    patches = jnp.pad(patches, ((0, 0), (0, p["w"].shape[0] - 49 * 3)))

    h = _mm_bias_relu(patches.astype(jnp.bfloat16), p["w"], p["b"])   # (Ho*Wo, 128)

    h3 = h.reshape(Ho, Wo, -1)
    hp = jnp.pad(h3, ((1, 1), (1, 1), (0, 0)))
    Hm, Wm = Ho // 2, Wo // 2
    m = functools.reduce(jnp.maximum,
                         [hp[i:i + 2 * Hm:2, j:j + 2 * Wm:2, :]
                          for i in range(3) for j in range(3)])
    out = jnp.pad(m, ((1, 1), (1, 1), (0, 0)))            # zero ring for layer1
    return out.reshape((Hm + 2) * (Wm + 2), -1)


# --------------------------- parameter construction -------------------------

def _he_conv_bn(key, c_in, c_out, kh, kw, gain=1.0):
    """Conv(no bias) + eval-mode BatchNorm folded into (w, b)."""
    kw_, kb = jax.random.split(key)
    fan_in = c_in * kh * kw
    w = jax.random.normal(kw_, (c_out, c_in, kh, kw), jnp.float32)
    w = w * jnp.sqrt(2.0 / fan_in) * gain
    gamma = jnp.ones((c_out,), jnp.float32)
    beta = 0.01 * jax.random.normal(kb, (c_out,), jnp.float32)
    run_mean = jnp.zeros((c_out,), jnp.float32)
    run_var = jnp.ones((c_out,), jnp.float32)
    scale = gamma * jax.lax.rsqrt(run_var + 1e-5)
    return w * scale[:, None, None, None], beta - run_mean * scale


def _mm_1x1(w, b, k_pad=0):
    co, ci = w.shape[0], w.shape[1]
    w_mm = w.reshape(co, ci).T
    if k_pad:
        w_mm = jnp.pad(w_mm, ((0, k_pad), (0, 0)))
    return w_mm.astype(jnp.bfloat16), b.reshape(1, co).astype(jnp.float32)


def _mm_3x3_taps(w, b):
    co, ci = w.shape[0], w.shape[1]
    w_t = w.transpose(2, 3, 1, 0).reshape(9, ci, co)      # (tap, Cin, Cout)
    return w_t.astype(jnp.bfloat16), b.reshape(1, co).astype(jnp.float32)


def make_stem_params(key):
    # Fold ToTensor (/255) + Normalize std into conv1 weights; mean handled as
    # an image shift so zero conv padding matches the PyTorch reference.
    w, b = _he_conv_bn(key, 3, 64, 7, 7)
    std = jnp.array([0.229, 0.224, 0.225], jnp.float32)
    mean = jnp.array([0.485, 0.456, 0.406], jnp.float32)
    w = w / (255.0 * std)[None, :, None, None]
    w_mm = w.transpose(2, 3, 1, 0).reshape(49 * 3, 64)
    # pad K 147 -> 160 and Cout 64 -> 128 (lane-dense output store)
    w_mm = jnp.pad(w_mm, ((0, 160 - 147), (0, 64))).astype(jnp.bfloat16)
    b_mm = jnp.pad(b, (0, 64)).reshape(1, 128).astype(jnp.float32)
    return {"w": w_mm, "b": b_mm, "shift": 255.0 * mean}


def make_bottleneck_params(key, inplanes, planes, stride, downsample, in_pad=0):
    k1, k2, k3, k4 = jax.random.split(key, 4)
    w1, b1 = _he_conv_bn(k1, inplanes, planes, 1, 1)
    w2, b2 = _he_conv_bn(k2, planes, planes, 3, 3)
    # small gain on the residual-branch tail keeps random-weight activations bounded
    w3, b3 = _he_conv_bn(k3, planes, planes * 4, 1, 1, gain=0.1)
    p = {}
    p["w1"], p["b1"] = _mm_1x1(w1, b1, k_pad=in_pad)
    w2_t, p["b2"] = _mm_3x3_taps(w2, b2)
    p["w2"] = w2_t if stride == 1 else w2_t.reshape(9 * planes, planes)
    p["w3"], p["b3"] = _mm_1x1(w3, b3)
    if downsample:
        wd, bd = _he_conv_bn(k4, inplanes, planes * 4, 1, 1)
        p["wds"], p["bds"] = _mm_1x1(wd, bd, k_pad=in_pad)
    return p


def make_resnet152_params(key, layers=(3, 8, 36)):
    # resnet152 children[:-3]: conv1, bn1, relu, maxpool, layer1, layer2, layer3
    k_stem, k1, k2, k3 = jax.random.split(key, 4)
    params = {"stem": make_stem_params(k_stem)}
    inplanes = 64
    for name, planes, stride, n_blocks, k in (("layer1", 64, 1, layers[0], k1),
                                              ("layer2", 128, 2, layers[1], k2),
                                              ("layer3", 256, 2, layers[2], k3)):
        bkeys = jax.random.split(k, n_blocks)
        in_pad = 64 if name == "layer1" else 0      # stem Cout padded 64 -> 128
        first = make_bottleneck_params(bkeys[0], inplanes, planes, stride,
                                       downsample=True, in_pad=in_pad)
        inplanes = planes * 4
        rest_blocks = [make_bottleneck_params(bkeys[i], inplanes, planes, 1,
                                              downsample=False)
                       for i in range(1, n_blocks)]
        stacked = {kk: jnp.stack([blk[kk] for blk in rest_blocks])
                   for kk in ("w1", "b1", "w2", "b2", "w3", "b3")}
        params[name] = {"first": first, "rest": stacked}
    return params


# --------------------------------- forward ----------------------------------

def _make_mask(H, W):
    Wp = W + 2
    idx = jnp.arange((H + 2) * Wp)
    row, col = idx // Wp, idx % Wp
    m = (row >= 1) & (row <= H) & (col >= 1) & (col <= W)
    return m.astype(jnp.float32).reshape(-1, 1)


def resnet_forward(img_hwc, params):
    # transform(x); x.unsqueeze(0) -> implicit batch of 1
    x = stem_forward(img_hwc, params["stem"])     # ((18*18), 128) padded layout
    H = W = 16
    mask = _make_mask(H, W)
    # layer1: block 0 (1x1-downsample residual), then gridded blocks 1..2
    x = fused_bottleneck_ds(x, mask, params["layer1"]["first"], H=H, W=W)
    x = fused_layer(x, mask, params["layer1"]["rest"], H=H, W=W)
    # layer2 / layer3: stride-2 first block, then ONE gridded call for the rest
    for name in ("layer2", "layer3"):
        x = stride2_bottleneck(x, params[name]["first"], H=H, W=W)
        H //= 2
        W //= 2
        mask = _make_mask(H, W)
        x = fused_layer(x, mask, params[name]["rest"], H=H, W=W)
    # pool5: AdaptiveAvgPool2d(1) + view(B, -1).  Padding ring is exactly zero,
    # so a flat sum / (H*W) equals the mean over the H*W valid pixels.
    feat = jnp.sum(x, axis=0, keepdims=True) / float(H * W)
    return feat                                    # (1, 1024) f32


# ----------------------------------- main ------------------------------------

if __name__ == "__main__":
    key = jax.random.PRNGKey(0)
    k_img, k_par = jax.random.split(key)

    # Small synthetic "image": HWC uint8, 64x64x3 (module's forward implies a
    # single un-batched image that is normalized and unsqueezed to batch 1).
    img = jax.random.randint(k_img, (64, 64, 3), 0, 256, dtype=jnp.int32).astype(jnp.uint8)

    params = make_resnet152_params(k_par)          # resnet152 layers (3, 8, 36)

    feat = resnet_forward(img, params)             # (1, 1024)
    feat = jax.block_until_ready(feat)

    assert feat.shape == (1, 1024), feat.shape
    assert feat.dtype == jnp.float32
    assert bool(jnp.all(jnp.isfinite(feat)))
    print("KERNEL_OK")
</pallas_src>

<mosaic_0001>
module attributes {stable_mosaic.version = 11 : i64} {
  func.func @_mm_bias_relu_kernel(%arg0: memref<1024x160xbf16, #tpu.memory_space<vmem>>, %arg1: memref<160x128xbf16, #tpu.memory_space<vmem>>, %arg2: memref<1x128xf32, #tpu.memory_space<vmem>>, %arg3: memref<1024x128xf32, #tpu.memory_space<vmem>>) attributes {dimension_semantics = [], scalar_prefetch = 0 : i64, scratch_operands = 0 : i64, tpu.core_type = #tpu.core_type<tc>} {
    %c0 = arith.constant 0 : index
    %c0_0 = arith.constant 0 : index
    %0 = vector.load %arg0[%c0, %c0_0] : memref<1024x160xbf16, #tpu.memory_space<vmem>>, vector<1024x160xbf16>
    %c0_1 = arith.constant 0 : index
    %c0_2 = arith.constant 0 : index
    %1 = vector.load %arg1[%c0_1, %c0_2] : memref<160x128xbf16, #tpu.memory_space<vmem>>, vector<160x128xbf16>
    %cst = arith.constant dense<0.000000e+00> : vector<1024x128xf32>
    %2 = tpu.matmul %0, %1, %cst {dimension_numbers = #tpu.dot_dimension_numbers<[1], [0], [0], [1], [0, 0, 1, 1], [], []>} : vector<1024x160xbf16>, vector<160x128xbf16>, vector<1024x128xf32> -> vector<1024x128xf32>
    %c0_3 = arith.constant 0 : index
    %c0_4 = arith.constant 0 : index
    %3 = vector.load %arg2[%c0_3, %c0_4] : memref<1x128xf32, #tpu.memory_space<vmem>>, vector<1x128xf32>
    %4 = vector.broadcast %3 : vector<1x128xf32> to vector<1024x128xf32>
    %5 = arith.addf %2, %4 : vector<1024x128xf32>
    %cst_5 = arith.constant 0.000000e+00 : f32
    %6 = vector.broadcast %cst_5 : f32 to vector<1024x128xf32>
    %7 = arith.maximumf %5, %6 : vector<1024x128xf32>
    %c0_6 = arith.constant 0 : index
    %c0_7 = arith.constant 0 : index
    %8 = vector.load %arg3[%c0_6, %c0_7] : memref<1024x128xf32, #tpu.memory_space<vmem>>, vector<1024x128xf32>
    tpu.vector_store %arg3[%c0_6, %c0_7], %7 {strides = array<i32>} : memref<1024x128xf32, #tpu.memory_space<vmem>>, vector<1024x128xf32>,
    return
  }
}

</mosaic_0001>

<bundles_post_ra>
// kernel: stem_forward.1
= control target key start
LH: loop header
LB: loop body
LE: loop exit
PB: predicated region body
PF: predicated region fallthrough
CT: control target
= control target key end

     0   :  { %v2231_v0 = vmov 0   ;;  %vm806_vm0 = vcmask 261120   ;;  %s3252_s1 = inlined_call_operand.vmem [shape: bf16[160,128], index: 1, kind: input, shape index: {}]   ;;  %s3253_s0 = inlined_call_operand.vmem [shape: bf16[1024,160], index: 0, kind: input, shape index: {}]   ;;  %s3254_s2 = inlined_call_operand.vmem [shape: f32[1,128], index: 2, kind: input, shape index: {}]   ;;  %s3255_s3 = inlined_call_operand.vmem [shape: f32[1024,128], index: 3, kind: output, shape index: {}]  }
   0x1   :  { %999 = vmatprep.subr.bf16.mxu0 %v2231_v0  ;;  %2007 = vmatprep.subr.bf16.mxu1 %v2231_v0  ;;  %v2028_v1 = vld [vmem:[%s3252_s1] sm:$0xff]   ;;  %v2029_v2 = vld [vmem:[%s3252_s1 + $0x8] sm:$0xff]   ;;  %v2030_v3 = vld [vmem:[%s3252_s1 + $0x10] sm:$0xff]  }
   0x2   :  { %1000 = vmatpush1.bf16.msra.mxu0 %v2028_v1  ;;  %2017 = vmatpush1.bf16.msra.mxu1 %v2028_v1  ;;  %v2031_v4 = vld [vmem:[%s3252_s1 + $0x18] sm:$0xff]   ;;  %v2040_v5 = vld [vmem:[%s3253_s0 + $0x4] ss:$8 sps:$4 sm:$0xff]   ;;  %v2034_v9 = vld [vmem:[%s3252_s1 + $0x30] sm:$0xff]  }
   0x3   :  { %1001 = vmatprep.subr.bf16.mxu0 %v2231_v0  ;;  %2008 = vmatprep.subr.bf16.mxu1 %v2231_v0  ;;  %v2043_v6 = vld [vmem:[%s3253_s0 + $0x204] ss:$8 sps:$4 sm:$0xff]   ;;  %v2035_v10 = vld [vmem:[%s3252_s1 + $0x38] sm:$0xff]   ;;  %v2038_v13 = vld [vmem:[%s3253_s0] ss:$8 sps:$4 sm:$0xff]  }
   0x4   :  { %1943 = vmatprep.mubr.msk.bf16.mxu0 %vm806_vm0, %v2040_v5  ;;  %v2032_v7 = vld [vmem:[%s3252_s1 + $0x20] sm:$0xff]   ;;  %1975 = vmatprep.mubr.msk.bf16.mxu1 %vm806_vm0, %v2043_v6  ;;  %v2033_v8 = vld [vmem:[%s3252_s1 + $0x28] sm:$0xff]   ;;  %v2044_v15 = vld [vmem:[%s3253_s0 + $0x14] ss:$8 sps:$4 sm:$0xff]  }
   0x5   :  { %v2036_v11 = vld [vmem:[%s3252_s1 + $0x40] sm:$0xff]   ;;  %v2037_v12 = vld [vmem:[%s3252_s1 + $0x48] sm:$0xff]   ;;  %v2046_v16 = vld [vmem:[%s3253_s0 + $0x214] ss:$8 sps:$4 sm:$0xff]  }
   0x6   :  { %1002 = vmatpush1.bf16.msra.mxu0 %v2029_v2  ;;  %2018 = vmatpush1.bf16.msra.mxu1 %v2029_v2  ;;  %v2041_v14 = vld [vmem:[%s3253_s0 + $0x200] ss:$8 sps:$4 sm:$0xff]   ;;  %v2048_v17 = vld [vmem:[%s3253_s0 + $0x10] ss:$8 sps:$4 sm:$0xff]   ;;  %v2050_v19 = vld [vmem:[%s3253_s0 + $0x24] ss:$8 sps:$4 sm:$0xff]  }
   0x7   :  { %1003 = vmatprep.subr.bf16.mxu0 %v2231_v0  ;;  %2009 = vmatprep.subr.bf16.mxu1 %v2231_v0  ;;  %v2049_v18 = vld [vmem:[%s3253_s0 + $0x210] ss:$8 sps:$4 sm:$0xff]   ;;  %v2052_v20 = vld [vmem:[%s3253_s0 + $0x224] ss:$8 sps:$4 sm:$0xff]   ;;  %v2054_v21 = vld [vmem:[%s3253_s0 + $0x20] ss:$8 sps:$4 sm:$0xff]  }
   0x8   :  { %v2055_v22 = vld [vmem:[%s3253_s0 + $0x220] ss:$8 sps:$4 sm:$0xff]   ;;  %v2056_v23 = vld [vmem:[%s3253_s0 + $0x34] ss:$8 sps:$4 sm:$0xff]   ;;  %v2060_v25 = vld [vmem:[%s3253_s0 + $0x30] ss:$8 sps:$4 sm:$0xff]  }
   0x9   :  { %v2058_v24 = vld [vmem:[%s3253_s0 + $0x234] ss:$8 sps:$4 sm:$0xff]   ;;  %v2061_v26 = vld [vmem:[%s3253_s0 + $0x230] ss:$8 sps:$4 sm:$0xff]   ;;  %v2062_v27 = vld [vmem:[%s3253_s0 + $0x44] ss:$8 sps:$4 sm:$0xff]  }
   0xa   :  { %1004 = vmatpush1.bf16.msra.mxu0 %v2030_v3  ;;  %2019 = vmatpush1.bf16.msra.mxu1 %v2030_v3  ;;  %v2064_v28 = vld [vmem:[%s3253_s0 + $0x244] ss:$8 sps:$4 sm:$0xff]   ;;  %v2066_v29 = vld [vmem:[%s3253_s0 + $0x40] ss:$8 sps:$4 sm:$0xff]   ;;  %v2068_v31 = vld [vmem:[%s3253_s0 + $0x54] ss:$8 sps:$4 sm:$0xff]  }
   0xb   :  { %1005 = vmatprep.subr.bf16.mxu0 %v2231_v0  ;;  %2010 = vmatprep.subr.bf16.mxu1 %v2231_v0  ;;  %v2067_v30 = vld [vmem:[%s3253_s0 + $0x240] ss:$8 sps:$4 sm:$0xff]   ;;  %v2070_v32 = vld [vmem:[%s3253_s0 + $0x254] ss:$8 sps:$4 sm:$0xff]   ;;  %v2072_v33 = vld [vmem:[%s3253_s0 + $0x50] ss:$8 sps:$4 sm:$0xff]  }
   0xc   :  { %v2073_v34 = vld [vmem:[%s3253_s0 + $0x250] ss:$8 sps:$4 sm:$0xff]   ;;  %v2074_v35 = vld [vmem:[%s3253_s0 + $0x64] ss:$8 sps:$4 sm:$0xff]   ;;  %v2078_v37 = vld [vmem:[%s3253_s0 + $0x60] ss:$8 sps:$4 sm:$0xff]  }
   0xd   :  { %v2076_v36 = vld [vmem:[%s3253_s0 + $0x264] ss:$8 sps:$4 sm:$0xff]   ;;  %v2079_v38 = vld [vmem:[%s3253_s0 + $0x260] ss:$8 sps:$4 sm:$0xff]   ;;  %v2080_v39 = vld [vmem:[%s3253_s0 + $0x74] ss:$8 sps:$4 sm:$0xff]  }
   0xe   :  { %1006 = vmatpush1.bf16.msra.mxu0 %v2031_v4  ;;  %2020 = vmatpush1.bf16.msra.mxu1 %v2031_v4  ;;  %v2082_v40 = vld [vmem:[%s3253_s0 + $0x274] ss:$8 sps:$4 sm:$0xff]   ;;  %v2084_v41 = vld [vmem:[%s3253_s0 + $0x70] ss:$8 sps:$4 sm:$0xff]   ;;  %v2086_v43 = vld [vmem:[%s3253_s0 + $0x84] ss:$8 sps:$4 sm:$0xff]  }
   0xf   :  { %1007 = vmatprep.subr.bf16.mxu0 %v2231_v0  ;;  %2011 = vmatprep.subr.bf16.mxu1 %v2231_v0  ;;  %v2085_v42 = vld [vmem:[%s3253_s0 + $0x270] ss:$8 sps:$4 sm:$0xff]   ;;  %v2088_v44 = vld [vmem:[%s3253_s0 + $0x284] ss:$8 sps:$4 sm:$0xff]   ;;  %v2090_v45 = vld [vmem:[%s3253_s0 + $0x80] ss:$8 sps:$4 sm:$0xff]  }
  0x10   :  { %v2091_v46 = vld [vmem:[%s3253_s0 + $0x280] ss:$8 sps:$4 sm:$0xff]   ;;  %v2092_v47 = vld [vmem:[%s3253_s0 + $0x94] ss:$8 sps:$4 sm:$0xff]   ;;  %v2096_v49 = vld [vmem:[%s3253_s0 + $0x90] ss:$8 sps:$4 sm:$0xff]  }
  0x11   :  { %v2094_v48 = vld [vmem:[%s3253_s0 + $0x294] ss:$8 sps:$4 sm:$0xff]   ;;  %v2097_v50 = vld [vmem:[%s3253_s0 + $0x290] ss:$8 sps:$4 sm:$0xff]   ;;  %v2098_v51 = vld [vmem:[%s3253_s0 + $0xa4] ss:$8 sps:$4 sm:$0xff]  }
  0x12   :  { %1008 = vmatpush1.bf16.msra.mxu0 %v2032_v7  ;;  %2021 = vmatpush1.bf16.msra.mxu1 %v2032_v7  ;;  %v2100_v52 = vld [vmem:[%s3253_s0 + $0x2a4] ss:$8 sps:$4 sm:$0xff]   ;;  %v2102_v53 = vld [vmem:[%s3253_s0 + $0xa0] ss:$8 sps:$4 sm:$0xff]   ;;  %v2104_v55 = vld [vmem:[%s3253_s0 + $0xb4] ss:$8 sps:$4 sm:$0xff]  }
  0x13   :  { %1009 = vmatprep.subr.bf16.mxu0 %v2231_v0  ;;  %2012 = vmatprep.subr.bf16.mxu1 %v2231_v0  ;;  %v2103_v54 = vld [vmem:[%s3253_s0 + $0x2a0] ss:$8 sps:$4 sm:$0xff]   ;;  %v2106_v56 = vld [vmem:[%s3253_s0 + $0x2b4] ss:$8 sps:$4 sm:$0xff]   ;;  %v2108_v57 = vld [vmem:[%s3253_s0 + $0xb0] ss:$8 sps:$4 sm:$0xff]  }
  0x14   :  { %v2109_v58 = vld [vmem:[%s3253_s0 + $0x2b0] ss:$8 sps:$4 sm:$0xff]   ;;  %v2110_v59 = vld [vmem:[%s3253_s0 + $0xc4] ss:$8 sps:$4 sm:$0xff]   ;;  %v2114_v61 = vld [vmem:[%s3253_s0 + $0xc0] ss:$8 sps:$4 sm:$0xff]  }
  0x15   :  { %v2112_v60 = vld [vmem:[%s3253_s0 + $0x2c4] ss:$8 sps:$4 sm:$0xff]   ;;  %v2115_v62 = vld [vmem:[%s3253_s0 + $0x2c0] ss:$8 sps:$4 sm:$0xff]   ;;  %v2116_v63 = vld [vmem:[%s3253_s0 + $0xd4] ss:$8 sps:$4 sm:$0xff]  }
  0x16   :  { %1010 = vmatpush1.bf16.msra.mxu0 %v2033_v8  ;;  %2022 = vmatpush1.bf16.msra.mxu1 %v2033_v8  ;;  %v2120_v1 = vld [vmem:[%s3253_s0 + $0xd0] ss:$8 sps:$4 sm:$0xff]   ;;  %v2122_v3 = vld [vmem:[%s3253_s0 + $0xe4] ss:$8 sps:$4 sm:$0xff]   ;;  %v2126_v5 = vld [vmem:[%s3253_s0 + $0xe0] ss:$8 sps:$4 sm:$0xff]  }
  0x17   :  { %1011 = vmatprep.subr.bf16.mxu0 %v2231_v0  ;;  %2013 = vmatprep.subr.bf16.mxu1 %v2231_v0  ;;  %v2121_v2 = vld [vmem:[%s3253_s0 + $0x2d0] ss:$8 sps:$4 sm:$0xff]   ;;  %v2124_v4 = vld [vmem:[%s3253_s0 + $0x2e4] ss:$8 sps:$4 sm:$0xff]   ;;  %v2127_v6 = vld [vmem:[%s3253_s0 + $0x2e0] ss:$8 sps:$4 sm:$0xff]  }
  0x18   :  { %v2128_v7 = vld [vmem:[%s3253_s0 + $0xf4] ss:$8 sps:$4 sm:$0xff]  }
  0x19   :  { %v2130_v8 = vld [vmem:[%s3253_s0 + $0x2f4] ss:$8 sps:$4 sm:$0xff]  }
  0x1a   :  { %1012 = vmatpush1.bf16.msra.mxu0 %v2034_v9  ;;  %2023 = vmatpush1.bf16.msra.mxu1 %v2034_v9  ;;  %v2132_v9 = vld [vmem:[%s3253_s0 + $0xf0] ss:$8 sps:$4 sm:$0xff]  }
  0x1b   :  { %1013 = vmatprep.subr.bf16.mxu0 %v2231_v0  ;;  %2014 = vmatprep.subr.bf16.mxu1 %v2231_v0 }
  0x1e   :  { %1014 = vmatpush1.bf16.msra.mxu0 %v2035_v10  ;;  %2024 = vmatpush1.bf16.msra.mxu1 %v2035_v10  ;;  %v2133_v10 = vld [vmem:[%s3253_s0 + $0x2f0] ss:$8 sps:$4 sm:$0xff]  }
  0x1f   :  { %1015 = vmatprep.subr.bf16.mxu0 %v2231_v0  ;;  %2015 = vmatprep.subr.bf16.mxu1 %v2231_v0 }
  0x22   :  { %1016 = vmatpush1.bf16.msra.mxu0 %v2036_v11  ;;  %2025 = vmatpush1.bf16.msra.mxu1 %v2036_v11  ;;  %v2134_v11 = vld [vmem:[%s3253_s0 + $0x104] ss:$8 sps:$4 sm:$0xff]  }
  0x23   :  { %1017 = vmatprep.subr.bf16.mxu0 %v2231_v0  ;;  %2016 = vmatprep.subr.bf16.mxu1 %v2231_v0  ;;  %v2118_v0 = vld [vmem:[%s3253_s0 + $0x2d4] ss:$8 sps:$4 sm:$0xff]  }
  0x26   :  { %1018 = vmatpush1.bf16.msra.mxu0 %v2037_v12  ;;  %2026 = vmatpush1.bf16.msra.mxu1 %v2037_v12  ;;  %v2136_v12 = vld [vmem:[%s3253_s0 + $0x304] ss:$8 sps:$4 sm:$0xff]  }
  0x29   :  { %1032 = vmatmul.mubr.bf16.vlgmr.msra.gmra.mrb[0].mxu0 %v2038_v13  ;;  %1288 = vmatmul.mubr.bf16.vlgmr.msra.gmra.mrb[0].mxu1 %v2041_v14  ;;  %v2138_v13 = vld [vmem:[%s3253_s0 + $0x100] ss:$8 sps:$4 sm:$0xff]  }
  0x2a   :  { %1944 = vmatprep.mubr.msk.bf16.mxu0 %vm806_vm0, %v2044_v15  ;;  %1976 = vmatprep.mubr.msk.bf16.mxu1 %vm806_vm0, %v2046_v16  ;;  %v2139_v14 = vld [vmem:[%s3253_s0 + $0x300] ss:$8 sps:$4 sm:$0xff]   ;;  %v2140_v15 = vld [vmem:[%s3253_s0 + $0x114] ss:$8 sps:$4 sm:$0xff]  }
  0x2b   :  { %v2142_v16 = vld [vmem:[%s3253_s0 + $0x314] ss:$8 sps:$4 sm:$0xff]  }
  0x31   :  { %1040 = vmatmul.mubr.bf16.gmra.mrb[4].mxu0 %v2048_v17  ;;  %1296 = vmatmul.mubr.bf16.gmra.mrb[4].mxu1 %v2049_v18  ;;  %v2144_v17 = vld [vmem:[%s3253_s0 + $0x110] ss:$8 sps:$4 sm:$0xff]  }
  0x32   :  { %1945 = vmatprep.mubr.msk.bf16.mxu0 %vm806_vm0, %v2050_v19  ;;  %1977 = vmatprep.mubr.msk.bf16.mxu1 %vm806_vm0, %v2052_v20  ;;  %v2145_v18 = vld [vmem:[%s3253_s0 + $0x310] ss:$8 sps:$4 sm:$0xff]   ;;  %v2146_v19 = vld [vmem:[%s3253_s0 + $0x124] ss:$8 sps:$4 sm:$0xff]  }
  0x33   :  { %v2148_v20 = vld [vmem:[%s3253_s0 + $0x324] ss:$8 sps:$4 sm:$0xff]  }
  0x39   :  { %1048 = vmatmul.mubr.bf16.gmra.mrb[8].mxu0 %v2054_v21  ;;  %1304 = vmatmul.mubr.bf16.gmra.mrb[8].mxu1 %v2055_v22  ;;  %v2150_v21 = vld [vmem:[%s3253_s0 + $0x120] ss:$8 sps:$4 sm:$0xff]  }
  0x3a   :  { %1946 = vmatprep.mubr.msk.bf16.mxu0 %vm806_vm0, %v2056_v23  ;;  %1978 = vmatprep.mubr.msk.bf16.mxu1 %vm806_vm0, %v2058_v24  ;;  %v2151_v22 = vld [vmem:[%s3253_s0 + $0x320] ss:$8 sps:$4 sm:$0xff]   ;;  %v2152_v23 = vld [vmem:[%s3253_s0 + $0x134] ss:$8 sps:$4 sm:$0xff]  }
  0x3b   :  { %v2154_v24 = vld [vmem:[%s3253_s0 + $0x334] ss:$8 sps:$4 sm:$0xff]  }
  0x41   :  { %1056 = vmatmul.mubr.bf16.gmra.mrb[12].mxu0 %v2060_v25  ;;  %1312 = vmatmul.mubr.bf16.gmra.mrb[12].mxu1 %v2061_v26  ;;  %v2156_v25 = vld [vmem:[%s3253_s0 + $0x130] ss:$8 sps:$4 sm:$0xff]  }
  0x42   :  { %1947 = vmatprep.mubr.msk.bf16.mxu0 %vm806_vm0, %v2062_v27  ;;  %1979 = vmatprep.mubr.msk.bf16.mxu1 %vm806_vm0, %v2064_v28  ;;  %v2157_v26 = vld [vmem:[%s3253_s0 + $0x330] ss:$8 sps:$4 sm:$0xff]   ;;  %v2158_v27 = vld [vmem:[%s3253_s0 + $0x144] ss:$8 sps:$4 sm:$0xff]  }
  0x43   :  { %v2160_v28 = vld [vmem:[%s3253_s0 + $0x344] ss:$8 sps:$4 sm:$0xff]  }
  0x49   :  { %1064 = vmatmul.mubr.bf16.gmra.mrb[16].mxu0 %v2066_v29  ;;  %1320 = vmatmul.mubr.bf16.gmra.mrb[16].mxu1 %v2067_v30  ;;  %v2162_v29 = vld [vmem:[%s3253_s0 + $0x140] ss:$8 sps:$4 sm:$0xff]  }
  0x4a   :  { %1948 = vmatprep.mubr.msk.bf16.mxu0 %vm806_vm0, %v2068_v31  ;;  %1980 = vmatprep.mubr.msk.bf16.mxu1 %vm806_vm0, %v2070_v32  ;;  %v2163_v30 = vld [vmem:[%s3253_s0 + $0x340] ss:$8 sps:$4 sm:$0xff]   ;;  %v2164_v31 = vld [vmem:[%s3253_s0 + $0x154] ss:$8 sps:$4 sm:$0xff]  }
  0x4b   :  { %v2166_v32 = vld [vmem:[%s3253_s0 + $0x354] ss:$8 sps:$4 sm:$0xff]  }
  0x51   :  { %1072 = vmatmul.mubr.bf16.gmra.mrb[20].mxu0 %v2072_v33  ;;  %1328 = vmatmul.mubr.bf16.gmra.mrb[20].mxu1 %v2073_v34  ;;  %v2168_v33 = vld [vmem:[%s3253_s0 + $0x150] ss:$8 sps:$4 sm:$0xff]  }
  0x52   :  { %1949 = vmatprep.mubr.msk.bf16.mxu0 %vm806_vm0, %v2074_v35  ;;  %1981 = vmatprep.mubr.msk.bf16.mxu1 %vm806_vm0, %v2076_v36  ;;  %v2169_v34 = vld [vmem:[%s3253_s0 + $0x350] ss:$8 sps:$4 sm:$0xff]   ;;  %v2170_v35 = vld [vmem:[%s3253_s0 + $0x164] ss:$8 sps:$4 sm:$0xff]  }
  0x53   :  { %v2172_v36 = vld [vmem:[%s3253_s0 + $0x364] ss:$8 sps:$4 sm:$0xff]  }
  0x59   :  { %1080 = vmatmul.mubr.bf16.gmra.mrb[24].mxu0 %v2078_v37  ;;  %1336 = vmatmul.mubr.bf16.gmra.mrb[24].mxu1 %v2079_v38  ;;  %v2174_v37 = vld [vmem:[%s3253_s0 + $0x160] ss:$8 sps:$4 sm:$0xff]  }
  0x5a   :  { %1950 = vmatprep.mubr.msk.bf16.mxu0 %vm806_vm0, %v2080_v39  ;;  %1982 = vmatprep.mubr.msk.bf16.mxu1 %vm806_vm0, %v2082_v40  ;;  %v2175_v38 = vld [vmem:[%s3253_s0 + $0x360] ss:$8 sps:$4 sm:$0xff]   ;;  %v2176_v39 = vld [vmem:[%s3253_s0 + $0x174] ss:$8 sps:$4 sm:$0xff]  }
  0x5b   :  { %v2178_v40 = vld [vmem:[%s3253_s0 + $0x374] ss:$8 sps:$4 sm:$0xff]  }
  0x61   :  { %1088 = vmatmul.mubr.bf16.gmra.mrb[28].mxu0 %v2084_v41  ;;  %1344 = vmatmul.mubr.bf16.gmra.mrb[28].mxu1 %v2085_v42  ;;  %v2180_v41 = vld [vmem:[%s3253_s0 + $0x170] ss:$8 sps:$4 sm:$0xff]  }
  0x62   :  { %1951 = vmatprep.mubr.msk.bf16.mxu0 %vm806_vm0, %v2086_v43  ;;  %1983 = vmatprep.mubr.msk.bf16.mxu1 %vm806_vm0, %v2088_v44  ;;  %v2181_v42 = vld [vmem:[%s3253_s0 + $0x370] ss:$8 sps:$4 sm:$0xff]   ;;  %v2182_v43 = vld [vmem:[%s3253_s0 + $0x184] ss:$8 sps:$4 sm:$0xff]  }
  0x63   :  { %v2184_v44 = vld [vmem:[%s3253_s0 + $0x384] ss:$8 sps:$4 sm:$0xff]  }
  0x69   :  { %1096 = vmatmul.mubr.bf16.gmra.mrb[32].mxu0 %v2090_v45  ;;  %1352 = vmatmul.mubr.bf16.gmra.mrb[32].mxu1 %v2091_v46  ;;  %v2186_v45 = vld [vmem:[%s3253_s0 + $0x180] ss:$8 sps:$4 sm:$0xff]  }
  0x6a   :  { %1952 = vmatprep.mubr.msk.bf16.mxu0 %vm806_vm0, %v2092_v47  ;;  %1984 = vmatprep.mubr.msk.bf16.mxu1 %vm806_vm0, %v2094_v48  ;;  %v2187_v46 = vld [vmem:[%s3253_s0 + $0x380] ss:$8 sps:$4 sm:$0xff]   ;;  %v2188_v47 = vld [vmem:[%s3253_s0 + $0x194] ss:$8 sps:$4 sm:$0xff]  }
  0x6b   :  { %v2190_v48 = vld [vmem:[%s3253_s0 + $0x394] ss:$8 sps:$4 sm:$0xff]  }
  0x71   :  { %1104 = vmatmul.mubr.bf16.gmra.mrb[36].mxu0 %v2096_v49  ;;  %1360 = vmatmul.mubr.bf16.gmra.mrb[36].mxu1 %v2097_v50  ;;  %v2192_v49 = vld [vmem:[%s3253_s0 + $0x190] ss:$8 sps:$4 sm:$0xff]  }
  0x72   :  { %1953 = vmatprep.mubr.msk.bf16.mxu0 %vm806_vm0, %v2098_v51  ;;  %1985 = vmatprep.mubr.msk.bf16.mxu1 %vm806_vm0, %v2100_v52  ;;  %v2193_v50 = vld [vmem:[%s3253_s0 + $0x390] ss:$8 sps:$4 sm:$0xff]   ;;  %v2194_v51 = vld [vmem:[%s3253_s0 + $0x1a4] ss:$8 sps:$4 sm:$0xff]  }
  0x73   :  { %v2196_v52 = vld [vmem:[%s3253_s0 + $0x3a4] ss:$8 sps:$4 sm:$0xff]  }
  0x79   :  { %1112 = vmatmul.mubr.bf16.gmra.mrb[40].mxu0 %v2102_v53  ;;  %1368 = vmatmul.mubr.bf16.gmra.mrb[40].mxu1 %v2103_v54  ;;  %v2198_v53 = vld [vmem:[%s3253_s0 + $0x1a0] ss:$8 sps:$4 sm:$0xff]  }
  0x7a   :  { %1954 = vmatprep.mubr.msk.bf16.mxu0 %vm806_vm0, %v2104_v55  ;;  %1986 = vmatprep.mubr.msk.bf16.mxu1 %vm806_vm0, %v2106_v56  ;;  %v2199_v54 = vld [vmem:[%s3253_s0 + $0x3a0] ss:$8 sps:$4 sm:$0xff]   ;;  %v2200_v55 = vld [vmem:[%s3253_s0 + $0x1b4] ss:$8 sps:$4 sm:$0xff]  }
  0x7b   :  { %v2202_v56 = vld [vmem:[%s3253_s0 + $0x3b4] ss:$8 sps:$4 sm:$0xff]  }
  0x81   :  { %1120 = vmatmul.mubr.bf16.gmra.mrb[44].mxu0 %v2108_v57  ;;  %1376 = vmatmul.mubr.bf16.gmra.mrb[44].mxu1 %v2109_v58  ;;  %v2669_v57 = vld [vmem:[%s3254_s2] ss:$0 sm:$0xff] }
  0x82   :  { %1955 = vmatprep.mubr.msk.bf16.mxu0 %vm806_vm0, %v2110_v59  ;;  %1987 = vmatprep.mubr.msk.bf16.mxu1 %vm806_vm0, %v2112_v60 }
  0x89   :  { %1128 = vmatmul.mubr.bf16.gmra.mrb[48].mxu0 %v2114_v61  ;;  %1384 = vmatmul.mubr.bf16.gmra.mrb[48].mxu1 %v2115_v62 }
  0x8a   :  { %1956 = vmatprep.mubr.msk.bf16.mxu0 %vm806_vm0, %v2116_v63  ;;  %1988 = vmatprep.mubr.msk.bf16.mxu1 %vm806_vm0, %v2118_v0  ;;  %v2204_v0 = vld [vmem:[%s3253_s0 + $0x1b0] ss:$8 sps:$4 sm:$0xff]  }
  0x91   :  { %1136 = vmatmul.mubr.bf16.gmra.mrb[52].mxu0 %v2120_v1  ;;  %1392 = vmatmul.mubr.bf16.gmra.mrb[52].mxu1 %v2121_v2  ;;  %v2205_v1 = vld [vmem:[%s3253_s0 + $0x3b0] ss:$8 sps:$4 sm:$0xff]  }
  0x92   :  { %1957 = vmatprep.mubr.msk.bf16.mxu0 %vm806_vm0, %v2122_v3  ;;  %1989 = vmatprep.mubr.msk.bf16.mxu1 %vm806_vm0, %v2124_v4  ;;  %v2206_v4 = vld [vmem:[%s3253_s0 + $0x1c4] ss:$8 sps:$4 sm:$0xff]  }
  0x99   :  { %1144 = vmatmul.mubr.bf16.gmra.mrb[56].mxu0 %v2126_v5  ;;  %1400 = vmatmul.mubr.bf16.gmra.mrb[56].mxu1 %v2127_v6  ;;  %v2208_v5 = vld [vmem:[%s3253_s0 + $0x3c4] ss:$8 sps:$4 sm:$0xff]  }
  0x9a   :  { %1958 = vmatprep.mubr.msk.bf16.mxu0 %vm806_vm0, %v2128_v7  ;;  %1990 = vmatprep.mubr.msk.bf16.mxu1 %vm806_vm0, %v2130_v8 }
  0xa1   :  { %1152 = vmatmul.mubr.bf16.gmra.mrb[60].mxu0 %v2132_v9  ;;  %1408 = vmatmul.mubr.bf16.gmra.mrb[60].mxu1 %v2133_v10 }
  0xa2   :  { %1959 = vmatprep.mubr.msk.bf16.mxu0 %vm806_vm0, %v2134_v11  ;;  %1991 = vmatprep.mubr.msk.bf16.mxu1 %vm806_vm0, %v2136_v12 }
  0xa9   :  { %1160 = vmatmul.mubr.bf16.gmra.mrb[64].mxu0 %v2138_v13  ;;  %1416 = vmatmul.mubr.bf16.gmra.mrb[64].mxu1 %v2139_v14 }
  0xaa   :  { %1960 = vmatprep.mubr.msk.bf16.mxu0 %vm806_vm0, %v2140_v15  ;;  %1992 = vmatprep.mubr.msk.bf16.mxu1 %vm806_vm0, %v2142_v16 }
  0xb1   :  { %1168 = vmatmul.mubr.bf16.gmra.mrb[68].mxu0 %v2144_v17  ;;  %1424 = vmatmul.mubr.bf16.gmra.mrb[68].mxu1 %v2145_v18 }
  0xb2   :  { %1961 = vmatprep.mubr.msk.bf16.mxu0 %vm806_vm0, %v2146_v19  ;;  %1993 = vmatprep.mubr.msk.bf16.mxu1 %vm806_vm0, %v2148_v20  ;;  %v2210_v20 = vld [vmem:[%s3253_s0 + $0x1c0] ss:$8 sps:$4 sm:$0xff]  }
  0xb9   :  { %1176 = vmatmul.mubr.bf16.gmra.mrb[72].mxu0 %v2150_v21  ;;  %1432 = vmatmul.mubr.bf16.gmra.mrb[72].mxu1 %v2151_v22  ;;  %v2211_v21 = vld [vmem:[%s3253_s0 + $0x3c0] ss:$8 sps:$4 sm:$0xff]  }
  0xba   :  { %1962 = vmatprep.mubr.msk.bf16.mxu0 %vm806_vm0, %v2152_v23  ;;  %1994 = vmatprep.mubr.msk.bf16.mxu1 %vm806_vm0, %v2154_v24  ;;  %v2212_v24 = vld [vmem:[%s3253_s0 + $0x1d4] ss:$8 sps:$4 sm:$0xff]  }
  0xc1   :  { %1184 = vmatmul.mubr.bf16.gmra.mrb[76].mxu0 %v2156_v25  ;;  %1440 = vmatmul.mubr.bf16.gmra.mrb[76].mxu1 %v2157_v26  ;;  %v2214_v25 = vld [vmem:[%s3253_s0 + $0x3d4] ss:$8 sps:$4 sm:$0xff]  }
  0xc2   :  { %1963 = vmatprep.mubr.msk.bf16.mxu0 %vm806_vm0, %v2158_v27  ;;  %1995 = vmatprep.mubr.msk.bf16.mxu1 %vm806_vm0, %v2160_v28 }
  0xc9   :  { %1192 = vmatmul.mubr.bf16.gmra.mrb[80].mxu0 %v2162_v29  ;;  %1448 = vmatmul.mubr.bf16.gmra.mrb[80].mxu1 %v2163_v30 }
  0xca   :  { %1964 = vmatprep.mubr.msk.bf16.mxu0 %vm806_vm0, %v2164_v31  ;;  %1996 = vmatprep.mubr.msk.bf16.mxu1 %vm806_vm0, %v2166_v32 }
  0xd1   :  { %1200 = vmatmul.mubr.bf16.gmra.mrb[84].mxu0 %v2168_v33  ;;  %1456 = vmatmul.mubr.bf16.gmra.mrb[84].mxu1 %v2169_v34 }
  0xd2   :  { %1965 = vmatprep.mubr.msk.bf16.mxu0 %vm806_vm0, %v2170_v35  ;;  %1997 = vmatprep.mubr.msk.bf16.mxu1 %vm806_vm0, %v2172_v36 }
  0xd9   :  { %1208 = vmatmul.mubr.bf16.gmra.mrb[88].mxu0 %v2174_v37  ;;  %1464 = vmatmul.mubr.bf16.gmra.mrb[88].mxu1 %v2175_v38 }
  0xda   :  { %1966 = vmatprep.mubr.msk.bf16.mxu0 %vm806_vm0, %v2176_v39  ;;  %1998 = vmatprep.mubr.msk.bf16.mxu1 %vm806_vm0, %v2178_v40  ;;  %v2216_v40 = vld [vmem:[%s3253_s0 + $0x1d0] ss:$8 sps:$4 sm:$0xff]  }
  0xe1   :  { %1216 = vmatmul.mubr.bf16.gmra.mrb[92].mxu0 %v2180_v41  ;;  %1472 = vmatmul.mubr.bf16.gmra.mrb[92].mxu1 %v2181_v42  ;;  %v2217_v41 = vld [vmem:[%s3253_s0 + $0x3d0] ss:$8 sps:$4 sm:$0xff]  }
  0xe2   :  { %1967 = vmatprep.mubr.msk.bf16.mxu0 %vm806_vm0, %v2182_v43  ;;  %1999 = vmatprep.mubr.msk.bf16.mxu1 %vm806_vm0, %v2184_v44  ;;  %v2218_v44 = vld [vmem:[%s3253_s0 + $0x1e4] ss:$8 sps:$4 sm:$0xff]  }
  0xe9   :  { %1224 = vmatmul.mubr.bf16.gmra.mrb[96].mxu0 %v2186_v45  ;;  %1480 = vmatmul.mubr.bf16.gmra.mrb[96].mxu1 %v2187_v46  ;;  %v2220_v45 = vld [vmem:[%s3253_s0 + $0x3e4] ss:$8 sps:$4 sm:$0xff]  }
  0xea   :  { %1968 = vmatprep.mubr.msk.bf16.mxu0 %vm806_vm0, %v2188_v47  ;;  %2000 = vmatprep.mubr.msk.bf16.mxu1 %vm806_vm0, %v2190_v48 }
  0xf1   :  { %1232 = vmatmul.mubr.bf16.gmra.mrb[100].mxu0 %v2192_v49  ;;  %1488 = vmatmul.mubr.bf16.gmra.mrb[100].mxu1 %v2193_v50 }
  0xf2   :  { %1969 = vmatprep.mubr.msk.bf16.mxu0 %vm806_vm0, %v2194_v51  ;;  %2001 = vmatprep.mubr.msk.bf16.mxu1 %vm806_vm0, %v2196_v52 }
  0xf9   :  { %1240 = vmatmul.mubr.bf16.gmra.mrb[104].mxu0 %v2198_v53  ;;  %1496 = vmatmul.mubr.bf16.gmra.mrb[104].mxu1 %v2199_v54 }
  0xfa   :  { %1970 = vmatprep.mubr.msk.bf16.mxu0 %vm806_vm0, %v2200_v55  ;;  %2002 = vmatprep.mubr.msk.bf16.mxu1 %vm806_vm0, %v2202_v56 }
  0xfc   :  { %v1033_v58 = vpop.f32.mrb[0].mxu0  ;;  %v1289_v59 = vpop.f32.mrb[0].mxu1 }
  0xfd   :  { %v1034_v60 = vadd.f32 %v2669_v57, %v1033_v58  ;;  %v1290_v61 = vadd.f32 %v2669_v57, %v1289_v59  ;;  %v1035_v62 = vpop.f32.mrb[1].mxu0  ;;  %v1291_v63 = vpop.f32.mrb[1].mxu1 }
  0xfe   :  { %v1036_v2 = vpop.f32.mrb[2].mxu0  ;;  %v1292_v3 = vpop.f32.mrb[2].mxu1  ;;  %v2223_v62 = vld [vmem:[%s3253_s0 + $0x3e0] ss:$8 sps:$4 sm:$0xff]  }
  0xff   :  { %v1544_v6 = vmax.f32 %v1034_v60, 0.0  ;;  %v1608_v7 = vmax.f32 %v1290_v61, 0.0  ;;  %v1037_v8 = vadd.f32 %v2669_v57, %v1036_v2  ;;  %v1293_v9 = vadd.f32 %v2669_v57, %v1292_v3  ;;  %v1038_v10 = vpop.f32.mrb[3].mxu0  ;;  %v1294_v11 = vpop.f32.mrb[3].mxu1  ;;  %v2222_v61 = vld [vmem:[%s3253_s0 + $0x1e0] ss:$8 sps:$4 sm:$0xff]  }
 0x100   :  { %v2226_v2 = vld [vmem:[%s3253_s0 + $0x3f4] ss:$8 sps:$4 sm:$0xff]  }
 0x101   :  { %1672 = vst [vmem:[%s3255_s3] sm:$0xff] %v1544_v6  ;;  %1736 = vst [vmem:[%s3255_s3 + $0x200] sm:$0xff] %v1608_v7  ;;  %v1545_v12 = vmax.f32 %v1037_v8, 0.0  ;;  %v1609_v13 = vmax.f32 %v1293_v9, 0.0  ;;  %1248 = vmatmul.mubr.bf16.gmra.mrb[108].mxu0 %v2204_v0  ;;  %1504 = vmatmul.mubr.bf16.gmra.mrb[108].mxu1 %v2205_v1  ;;  %v2224_v1 = vld [vmem:[%s3253_s0 + $0x1f4] ss:$8 sps:$4 sm:$0xff]  }
 0x102   :  { %1971 = vmatprep.mubr.msk.bf16.mxu0 %vm806_vm0, %v2206_v4  ;;  %2003 = vmatprep.mubr.msk.bf16.mxu1 %vm806_vm0, %v2208_v5 }
 0x103   :  { %1673 = vst [vmem:[%s3255_s3 + $0x8] sm:$0xff] %v1545_v12  ;;  %1737 = vst [vmem:[%s3255_s3 + $0x208] sm:$0xff] %v1609_v13 }
 0x104   :  { %v1041_v14 = vpop.f32.mrb[4].mxu0  ;;  %v1297_v15 = vpop.f32.mrb[4].mxu1 }
 0x105   :  { %v1042_v16 = vadd.f32 %v2669_v57, %v1041_v14  ;;  %v1298_v17 = vadd.f32 %v2669_v57, %v1297_v15  ;;  %v1043_v18 = vpop.f32.mrb[5].mxu0  ;;  %v1299_v19 = vpop.f32.mrb[5].mxu1 }
 0x106   :  { %v1044_v22 = vpop.f32.mrb[6].mxu0  ;;  %v1300_v23 = vpop.f32.mrb[6].mxu1  ;;  %v2229_v18 = vld [vmem:[%s3253_s0 + $0x3f0] ss:$8 sps:$4 sm:$0xff]  }
 0x107   :  { %v1546_v26 = vmax.f32 %v1042_v16, 0.0  ;;  %v1610_v27 = vmax.f32 %v1298_v17, 0.0  ;;  %v1045_v28 = vadd.f32 %v2669_v57, %v1044_v22  ;;  %v1301_v29 = vadd.f32 %v2669_v57, %v1300_v23  ;;  %v1046_v30 = vpop.f32.mrb[7].mxu0  ;;  %v1302_v31 = vpop.f32.mrb[7].mxu1  ;;  %v2228_v17 = vld [vmem:[%s3253_s0 + $0x1f0] ss:$8 sps:$4 sm:$0xff]  }
 0x109   :  { %1674 = vst [vmem:[%s3255_s3 + $0x10] sm:$0xff] %v1546_v26  ;;  %1738 = vst [vmem:[%s3255_s3 + $0x210] sm:$0xff] %v1610_v27  ;;  %v1547_v32 = vmax.f32 %v1045_v28, 0.0  ;;  %v1611_v33 = vmax.f32 %v1301_v29, 0.0  ;;  %1256 = vmatmul.mubr.bf16.gmra.mrb[112].mxu0 %v2210_v20  ;;  %1512 = vmatmul.mubr.bf16.gmra.mrb[112].mxu1 %v2211_v21 }
 0x10a   :  { %1972 = vmatprep.mubr.msk.bf16.mxu0 %vm806_vm0, %v2212_v24  ;;  %2004 = vmatprep.mubr.msk.bf16.mxu1 %vm806_vm0, %v2214_v25 }
 0x10b   :  { %1675 = vst [vmem:[%s3255_s3 + $0x18] sm:$0xff] %v1547_v32  ;;  %1739 = vst [vmem:[%s3255_s3 + $0x218] sm:$0xff] %v1611_v33 }
 0x10c   :  { %v1049_v34 = vpop.f32.mrb[8].mxu0  ;;  %v1305_v35 = vpop.f32.mrb[8].mxu1 }
 0x10d   :  { %v1050_v36 = vadd.f32 %v2669_v57, %v1049_v34  ;;  %v1306_v37 = vadd.f32 %v2669_v57, %v1305_v35  ;;  %v1051_v38 = vpop.f32.mrb[9].mxu0  ;;  %v1307_v39 = vpop.f32.mrb[9].mxu1 }
 0x10e   :  { %v1052_v42 = vpop.f32.mrb[10].mxu0  ;;  %v1308_v43 = vpop.f32.mrb[10].mxu1 }
 0x10f   :  { %v1548_v46 = vmax.f32 %v1050_v36, 0.0  ;;  %v1612_v47 = vmax.f32 %v1306_v37, 0.0  ;;  %v1053_v48 = vadd.f32 %v2669_v57, %v1052_v42  ;;  %v1309_v49 = vadd.f32 %v2669_v57, %v1308_v43  ;;  %v1054_v50 = vpop.f32.mrb[11].mxu0  ;;  %v1310_v51 = vpop.f32.mrb[11].mxu1 }
 0x111   :  { %1676 = vst [vmem:[%s3255_s3 + $0x20] sm:$0xff] %v1548_v46  ;;  %1740 = vst [vmem:[%s3255_s3 + $0x220] sm:$0xff] %v1612_v47  ;;  %v1549_v52 = vmax.f32 %v1053_v48, 0.0  ;;  %v1613_v53 = vmax.f32 %v1309_v49, 0.0  ;;  %1264 = vmatmul.mubr.bf16.gmra.mrb[116].mxu0 %v2216_v40  ;;  %1520 = vmatmul.mubr.bf16.gmra.mrb[116].mxu1 %v2217_v41 }
 0x112   :  { %1973 = vmatprep.mubr.msk.bf16.mxu0 %vm806_vm0, %v2218_v44  ;;  %2005 = vmatprep.mubr.msk.bf16.mxu1 %vm806_vm0, %v2220_v45 }
 0x113   :  { %1677 = vst [vmem:[%s3255_s3 + $0x28] sm:$0xff] %v1549_v52  ;;  %1741 = vst [vmem:[%s3255_s3 + $0x228] sm:$0xff] %v1613_v53 }
 0x114   :  { %v1057_v54 = vpop.f32.mrb[12].mxu0  ;;  %v1313_v55 = vpop.f32.mrb[12].mxu1 }
 0x115   :  { %v1058_v56 = vadd.f32 %v2669_v57, %v1057_v54  ;;  %v1314_v58 = vadd.f32 %v2669_v57, %v1313_v55  ;;  %v1059_v59 = vpop.f32.mrb[13].mxu0  ;;  %v1315_v60 = vpop.f32.mrb[13].mxu1 }
 0x116   :  { %v1060_v63 = vpop.f32.mrb[14].mxu0  ;;  %v1316_v0 = vpop.f32.mrb[14].mxu1 }
 0x117   :  { %v1550_v3 = vmax.f32 %v1058_v56, 0.0  ;;  %v1614_v4 = vmax.f32 %v1314_v58, 0.0  ;;  %v1061_v5 = vadd.f32 %v2669_v57, %v1060_v63  ;;  %v1317_v6 = vadd.f32 %v2669_v57, %v1316_v0  ;;  %v1062_v7 = vpop.f32.mrb[15].mxu0  ;;  %v1318_v8 = vpop.f32.mrb[15].mxu1 }
 0x119   :  { %1678 = vst [vmem:[%s3255_s3 + $0x30] sm:$0xff] %v1550_v3  ;;  %1742 = vst [vmem:[%s3255_s3 + $0x230] sm:$0xff] %v1614_v4  ;;  %v1551_v9 = vmax.f32 %v1061_v5, 0.0  ;;  %v1615_v10 = vmax.f32 %v1317_v6, 0.0  ;;  %1272 = vmatmul.mubr.bf16.gmra.mrb[120].mxu0 %v2222_v61  ;;  %1528 = vmatmul.mubr.bf16.gmra.mrb[120].mxu1 %v2223_v62 }
 0x11a   :  { %1974 = vmatprep.mubr.msk.bf16.mxu0 %vm806_vm0, %v2224_v1  ;;  %2006 = vmatprep.mubr.msk.bf16.mxu1 %vm806_vm0, %v2226_v2 }
 0x11b   :  { %1679 = vst [vmem:[%s3255_s3 + $0x38] sm:$0xff] %v1551_v9  ;;  %1743 = vst [vmem:[%s3255_s3 + $0x238] sm:$0xff] %v1615_v10 }
 0x11c   :  { %v1065_v11 = vpop.f32.mrb[16].mxu0  ;;  %v1321_v12 = vpop.f32.mrb[16].mxu1 }
 0x11d   :  { %v1066_v13 = vadd.f32 %v2669_v57, %v1065_v11  ;;  %v1322_v14 = vadd.f32 %v2669_v57, %v1321_v12  ;;  %v1067_v15 = vpop.f32.mrb[17].mxu0  ;;  %v1323_v16 = vpop.f32.mrb[17].mxu1 }
 0x11e   :  { %v1068_v19 = vpop.f32.mrb[18].mxu0  ;;  %v1324_v20 = vpop.f32.mrb[18].mxu1 }
 0x11f   :  { %v1552_v21 = vmax.f32 %v1066_v13, 0.0  ;;  %v1616_v22 = vmax.f32 %v1322_v14, 0.0  ;;  %v1069_v23 = vadd.f32 %v2669_v57, %v1068_v19  ;;  %v1325_v24 = vadd.f32 %v2669_v57, %v1324_v20  ;;  %v1070_v25 = vpop.f32.mrb[19].mxu0  ;;  %v1326_v26 = vpop.f32.mrb[19].mxu1 }
 0x121   :  { %1680 = vst [vmem:[%s3255_s3 + $0x40] sm:$0xff] %v1552_v21  ;;  %1744 = vst [vmem:[%s3255_s3 + $0x240] sm:$0xff] %v1616_v22  ;;  %v1553_v27 = vmax.f32 %v1069_v23, 0.0  ;;  %v1617_v28 = vmax.f32 %v1325_v24, 0.0  ;;  %1280 = vmatmul.mubr.bf16.gmra.mrb[124].mxu0 %v2228_v17  ;;  %1536 = vmatmul.mubr.bf16.gmra.mrb[124].mxu1 %v2229_v18 }
 0x123   :  { %1681 = vst [vmem:[%s3255_s3 + $0x48] sm:$0xff] %v1553_v27  ;;  %1745 = vst [vmem:[%s3255_s3 + $0x248] sm:$0xff] %v1617_v28 }
 0x124   :  { %v1073_v29 = vpop.f32.mrb[20].mxu0  ;;  %v1329_v30 = vpop.f32.mrb[20].mxu1 }
 0x125   :  { %v1074_v31 = vadd.f32 %v2669_v57, %v1073_v29  ;;  %v1330_v32 = vadd.f32 %v2669_v57, %v1329_v30  ;;  %v1075_v33 = vpop.f32.mrb[21].mxu0  ;;  %v1331_v34 = vpop.f32.mrb[21].mxu1 }
 0x126   :  { %v1076_v35 = vpop.f32.mrb[22].mxu0  ;;  %v1332_v36 = vpop.f32.mrb[22].mxu1 }
 0x127   :  { %v1554_v37 = vmax.f32 %v1074_v31, 0.0  ;;  %v1618_v38 = vmax.f32 %v1330_v32, 0.0  ;;  %v1077_v39 = vadd.f32 %v2669_v57, %v1076_v35  ;;  %v1333_v40 = vadd.f32 %v2669_v57, %v1332_v36  ;;  %v1078_v41 = vpop.f32.mrb[23].mxu0  ;;  %v1334_v42 = vpop.f32.mrb[23].mxu1 }
 0x129   :  { %1682 = vst [vmem:[%s3255_s3 + $0x50] sm:$0xff] %v1554_v37  ;;  %1746 = vst [vmem:[%s3255_s3 + $0x250] sm:$0xff] %v1618_v38  ;;  %v1555_v43 = vmax.f32 %v1077_v39, 0.0  ;;  %v1619_v44 = vmax.f32 %v1333_v40, 0.0 }
 0x12b   :  { %1683 = vst [vmem:[%s3255_s3 + $0x58] sm:$0xff] %v1555_v43  ;;  %1747 = vst [vmem:[%s3255_s3 + $0x258] sm:$0xff] %v1619_v44 }
 0x12c   :  { %v1081_v45 = vpop.f32.mrb[24].mxu0  ;;  %v1337_v46 = vpop.f32.mrb[24].mxu1 }
 0x12d   :  { %v1082_v47 = vadd.f32 %v2669_v57, %v1081_v45  ;;  %v1338_v48 = vadd.f32 %v2669_v57, %v1337_v46  ;;  %v1083_v49 = vpop.f32.mrb[25].mxu0  ;;  %v1339_v50 = vpop.f32.mrb[25].mxu1 }
 0x12e   :  { %v1084_v51 = vpop.f32.mrb[26].mxu0  ;;  %v1340_v52 = vpop.f32.mrb[26].mxu1 }
 0x12f   :  { %v1556_v53 = vmax.f32 %v1082_v47, 0.0  ;;  %v1620_v54 = vmax.f32 %v1338_v48, 0.0  ;;  %v1085_v55 = vadd.f32 %v2669_v57, %v1084_v51  ;;  %v1341_v56 = vadd.f32 %v2669_v57, %v1340_v52  ;;  %v1086_v58 = vpop.f32.mrb[27].mxu0  ;;  %v1342_v59 = vpop.f32.mrb[27].mxu1 }
 0x131   :  { %1684 = vst [vmem:[%s3255_s3 + $0x60] sm:$0xff] %v1556_v53  ;;  %1748 = vst [vmem:[%s3255_s3 + $0x260] sm:$0xff] %v1620_v54  ;;  %v1557_v60 = vmax.f32 %v1085_v55, 0.0  ;;  %v1621_v61 = vmax.f32 %v1341_v56, 0.0 }
 0x133   :  { %1685 = vst [vmem:[%s3255_s3 + $0x68] sm:$0xff] %v1557_v60  ;;  %1749 = vst [vmem:[%s3255_s3 + $0x268] sm:$0xff] %v1621_v61 }
 0x134   :  { %v1089_v62 = vpop.f32.mrb[28].mxu0  ;;  %v1345_v63 = vpop.f32.mrb[28].mxu1 }
 0x135   :  { %v1090_v0 = vadd.f32 %v2669_v57, %v1089_v62  ;;  %v1346_v1 = vadd.f32 %v2669_v57, %v1345_v63  ;;  %v1091_v2 = vpop.f32.mrb[29].mxu0  ;;  %v1347_v3 = vpop.f32.mrb[29].mxu1 }
 0x136   :  { %v1092_v4 = vpop.f32.mrb[30].mxu0  ;;  %v1348_v5 = vpop.f32.mrb[30].mxu1 }
 0x137   :  { %v1558_v6 = vmax.f32 %v1090_v0, 0.0  ;;  %v1622_v7 = vmax.f32 %v1346_v1, 0.0  ;;  %v1093_v8 = vadd.f32 %v2669_v57, %v1092_v4  ;;  %v1349_v9 = vadd.f32 %v2669_v57, %v1348_v5  ;;  %v1094_v10 = vpop.f32.mrb[31].mxu0  ;;  %v1350_v11 = vpop.f32.mrb[31].mxu1 }
 0x139   :  { %1686 = vst [vmem:[%s3255_s3 + $0x70] sm:$0xff] %v1558_v6  ;;  %1750 = vst [vmem:[%s3255_s3 + $0x270] sm:$0xff] %v1622_v7  ;;  %v1559_v12 = vmax.f32 %v1093_v8, 0.0  ;;  %v1623_v13 = vmax.f32 %v1349_v9, 0.0 }
 0x13b   :  { %1687 = vst [vmem:[%s3255_s3 + $0x78] sm:$0xff] %v1559_v12  ;;  %1751 = vst [vmem:[%s3255_s3 + $0x278] sm:$0xff] %v1623_v13 }
 0x13c   :  { %v1097_v14 = vpop.f32.mrb[32].mxu0  ;;  %v1353_v15 = vpop.f32.mrb[32].mxu1 }
 0x13d   :  { %v1098_v16 = vadd.f32 %v2669_v57, %v1097_v14  ;;  %v1354_v17 = vadd.f32 %v2669_v57, %v1353_v15  ;;  %v1099_v18 = vpop.f32.mrb[33].mxu0  ;;  %v1355_v19 = vpop.f32.mrb[33].mxu1 }
 0x13e   :  { %v1100_v20 = vpop.f32.mrb[34].mxu0  ;;  %v1356_v21 = vpop.f32.mrb[34].mxu1 }
 0x13f   :  { %v1560_v22 = vmax.f32 %v1098_v16, 0.0  ;;  %v1624_v23 = vmax.f32 %v1354_v17, 0.0  ;;  %v1101_v24 = vadd.f32 %v2669_v57, %v1100_v20  ;;  %v1357_v25 = vadd.f32 %v2669_v57, %v1356_v21  ;;  %v1102_v26 = vpop.f32.mrb[35].mxu0  ;;  %v1358_v27 = vpop.f32.mrb[35].mxu1 }
 0x141   :  { %1688 = vst [vmem:[%s3255_s3 + $0x80] sm:$0xff] %v1560_v22  ;;  %1752 = vst [vmem:[%s3255_s3 + $0x280] sm:$0xff] %v1624_v23  ;;  %v1561_v28 = vmax.f32 %v1101_v24, 0.0  ;;  %v1625_v29 = vmax.f32 %v1357_v25, 0.0 }
 0x143   :  { %1689 = vst [vmem:[%s3255_s3 + $0x88] sm:$0xff] %v1561_v28  ;;  %1753 = vst [vmem:[%s3255_s3 + $0x288] sm:$0xff] %v1625_v29 }
 0x144   :  { %v1105_v30 = vpop.f32.mrb[36].mxu0  ;;  %v1361_v31 = vpop.f32.mrb[36].mxu1 }
 0x145   :  { %v1106_v32 = vadd.f32 %v2669_v57, %v1105_v30  ;;  %v1362_v33 = vadd.f32 %v2669_v57, %v1361_v31  ;;  %v1107_v34 = vpop.f32.mrb[37].mxu0  ;;  %v1363_v35 = vpop.f32.mrb[37].mxu1 }
 0x146   :  { %v1108_v36 = vpop.f32.mrb[38].mxu0  ;;  %v1364_v37 = vpop.f32.mrb[38].mxu1 }
 0x147   :  { %v1562_v38 = vmax.f32 %v1106_v32, 0.0  ;;  %v1626_v39 = vmax.f32 %v1362_v33, 0.0  ;;  %v1109_v40 = vadd.f32 %v2669_v57, %v1108_v36  ;;  %v1365_v41 = vadd.f32 %v2669_v57, %v1364_v37  ;;  %v1110_v42 = vpop.f32.mrb[39].mxu0  ;;  %v1366_v43 = vpop.f32.mrb[39].mxu1 }
 0x149   :  { %1690 = vst [vmem:[%s3255_s3 + $0x90] sm:$0xff] %v1562_v38  ;;  %1754 = vst [vmem:[%s3255_s3 + $0x290] sm:$0xff] %v1626_v39  ;;  %v1563_v44 = vmax.f32 %v1109_v40, 0.0  ;;  %v1627_v45 = vmax.f32 %v1365_v41, 0.0 }
 0x14b   :  { %1691 = vst [vmem:[%s3255_s3 + $0x98] sm:$0xff] %v1563_v44  ;;  %1755 = vst [vmem:[%s3255_s3 + $0x298] sm:$0xff] %v1627_v45 }
 0x14c   :  { %v1113_v46 = vpop.f32.mrb[40].mxu0  ;;  %v1369_v47 = vpop.f32.mrb[40].mxu1 }
 0x14d   :  { %v1114_v48 = vadd.f32 %v2669_v57, %v1113_v46  ;;  %v1370_v49 = vadd.f32 %v2669_v57, %v1369_v47  ;;  %v1115_v50 = vpop.f32.mrb[41].mxu0  ;;  %v1371_v51 = vpop.f32.mrb[41].mxu1 }
 0x14e   :  { %v1116_v52 = vpop.f32.mrb[42].mxu0  ;;  %v1372_v53 = vpop.f32.mrb[42].mxu1 }
 0x14f   :  { %v1564_v54 = vmax.f32 %v1114_v48, 0.0  ;;  %v1628_v55 = vmax.f32 %v1370_v49, 0.0  ;;  %v1117_v56 = vadd.f32 %v2669_v57, %v1116_v52  ;;  %v1373_v58 = vadd.f32 %v2669_v57, %v1372_v53  ;;  %v1118_v59 = vpop.f32.mrb[43].mxu0  ;;  %v1374_v60 = vpop.f32.mrb[43].mxu1 }
 0x151   :  { %1692 = vst [vmem:[%s3255_s3 + $0xa0] sm:$0xff] %v1564_v54  ;;  %1756 = vst [vmem:[%s3255_s3 + $0x2a0] sm:$0xff] %v1628_v55  ;;  %v1565_v61 = vmax.f32 %v1117_v56, 0.0  ;;  %v1629_v62 = vmax.f32 %v1373_v58, 0.0 }
 0x153   :  { %1693 = vst [vmem:[%s3255_s3 + $0xa8] sm:$0xff] %v1565_v61  ;;  %1757 = vst [vmem:[%s3255_s3 + $0x2a8] sm:$0xff] %v1629_v62 }
 0x154   :  { %v1121_v63 = vpop.f32.mrb[44].mxu0  ;;  %v1377_v0 = vpop.f32.mrb[44].mxu1 }
 0x155   :  { %v1122_v1 = vadd.f32 %v2669_v57, %v1121_v63  ;;  %v1378_v2 = vadd.f32 %v2669_v57, %v1377_v0  ;;  %v1123_v3 = vpop.f32.mrb[45].mxu0  ;;  %v1379_v4 = vpop.f32.mrb[45].mxu1 }
 0x156   :  { %v1124_v5 = vpop.f32.mrb[46].mxu0  ;;  %v1380_v6 = vpop.f32.mrb[46].mxu1 }
 0x157   :  { %v1566_v7 = vmax.f32 %v1122_v1, 0.0  ;;  %v1630_v8 = vmax.f32 %v1378_v2, 0.0  ;;  %v1125_v9 = vadd.f32 %v2669_v57, %v1124_v5  ;;  %v1381_v10 = vadd.f32 %v2669_v57, %v1380_v6  ;;  %v1126_v11 = vpop.f32.mrb[47].mxu0  ;;  %v1382_v12 = vpop.f32.mrb[47].mxu1 }
 0x159   :  { %1694 = vst [vmem:[%s3255_s3 + $0xb0] sm:$0xff] %v1566_v7  ;;  %1758 = vst [vmem:[%s3255_s3 + $0x2b0] sm:$0xff] %v1630_v8  ;;  %v1567_v13 = vmax.f32 %v1125_v9, 0.0  ;;  %v1631_v14 = vmax.f32 %v1381_v10, 0.0 }
 0x15b   :  { %1695 = vst [vmem:[%s3255_s3 + $0xb8] sm:$0xff] %v1567_v13  ;;  %1759 = vst [vmem:[%s3255_s3 + $0x2b8] sm:$0xff] %v1631_v14 }
 0x15c   :  { %v1129_v15 = vpop.f32.mrb[48].mxu0  ;;  %v1385_v16 = vpop.f32.mrb[48].mxu1 }
 0x15d   :  { %v1130_v17 = vadd.f32 %v2669_v57, %v1129_v15  ;;  %v1386_v18 = vadd.f32 %v2669_v57, %v1385_v16  ;;  %v1131_v19 = vpop.f32.mrb[49].mxu0  ;;  %v1387_v20 = vpop.f32.mrb[49].mxu1 }
 0x15e   :  { %v1132_v21 = vpop.f32.mrb[50].mxu0  ;;  %v1388_v22 = vpop.f32.mrb[50].mxu1 }
 0x15f   :  { %v1568_v23 = vmax.f32 %v1130_v17, 0.0  ;;  %v1632_v24 = vmax.f32 %v1386_v18, 0.0  ;;  %v1133_v25 = vadd.f32 %v2669_v57, %v1132_v21  ;;  %v1389_v26 = vadd.f32 %v2669_v57, %v1388_v22  ;;  %v1134_v27 = vpop.f32.mrb[51].mxu0  ;;  %v1390_v28 = vpop.f32.mrb[51].mxu1 }
 0x161   :  { %1696 = vst [vmem:[%s3255_s3 + $0xc0] sm:$0xff] %v1568_v23  ;;  %1760 = vst [vmem:[%s3255_s3 + $0x2c0] sm:$0xff] %v1632_v24  ;;  %v1569_v29 = vmax.f32 %v1133_v25, 0.0  ;;  %v1633_v30 = vmax.f32 %v1389_v26, 0.0 }
 0x163   :  { %1697 = vst [vmem:[%s3255_s3 + $0xc8] sm:$0xff] %v1569_v29  ;;  %1761 = vst [vmem:[%s3255_s3 + $0x2c8] sm:$0xff] %v1633_v30 }
 0x164   :  { %v1137_v31 = vpop.f32.mrb[52].mxu0  ;;  %v1393_v32 = vpop.f32.mrb[52].mxu1 }
 0x165   :  { %v1138_v33 = vadd.f32 %v2669_v57, %v1137_v31  ;;  %v1394_v34 = vadd.f32 %v2669_v57, %v1393_v32  ;;  %v1139_v35 = vpop.f32.mrb[53].mxu0  ;;  %v1395_v36 = vpop.f32.mrb[53].mxu1 }
 0x166   :  { %v1140_v37 = vpop.f32.mrb[54].mxu0  ;;  %v1396_v38 = vpop.f32.mrb[54].mxu1 }
 0x167   :  { %v1570_v39 = vmax.f32 %v1138_v33, 0.0  ;;  %v1634_v40 = vmax.f32 %v1394_v34, 0.0  ;;  %v1141_v41 = vadd.f32 %v2669_v57, %v1140_v37  ;;  %v1397_v42 = vadd.f32 %v2669_v57, %v1396_v38  ;;  %v1142_v43 = vpop.f32.mrb[55].mxu0  ;;  %v1398_v44 = vpop.f32.mrb[55].mxu1 }
 0x169   :  { %1698 = vst [vmem:[%s3255_s3 + $0xd0] sm:$0xff] %v1570_v39  ;;  %1762 = vst [vmem:[%s3255_s3 + $0x2d0] sm:$0xff] %v1634_v40  ;;  %v1571_v45 = vmax.f32 %v1141_v41, 0.0  ;;  %v1635_v46 = vmax.f32 %v1397_v42, 0.0 }
 0x16b   :  { %1699 = vst [vmem:[%s3255_s3 + $0xd8] sm:$0xff] %v1571_v45  ;;  %1763 = vst [vmem:[%s3255_s3 + $0x2d8] sm:$0xff] %v1635_v46 }
 0x16c   :  { %v1145_v47 = vpop.f32.mrb[56].mxu0  ;;  %v1401_v48 = vpop.f32.mrb[56].mxu1 }
 0x16d   :  { %v1146_v49 = vadd.f32 %v2669_v57, %v1145_v47  ;;  %v1402_v50 = vadd.f32 %v2669_v57, %v1401_v48  ;;  %v1147_v51 = vpop.f32.mrb[57].mxu0  ;;  %v1403_v52 = vpop.f32.mrb[57].mxu1 }
 0x16e   :  { %v1148_v53 = vpop.f32.mrb[58].mxu0  ;;  %v1404_v54 = vpop.f32.mrb[58].mxu1 }
 0x16f   :  { %v1572_v55 = vmax.f32 %v1146_v49, 0.0  ;;  %v1636_v56 = vmax.f32 %v1402_v50, 0.0  ;;  %v1149_v58 = vadd.f32 %v2669_v57, %v1148_v53  ;;  %v1405_v59 = vadd.f32 %v2669_v57, %v1404_v54  ;;  %v1150_v60 = vpop.f32.mrb[59].mxu0  ;;  %v1406_v61 = vpop.f32.mrb[59].mxu1 }
 0x171   :  { %1700 = vst [vmem:[%s3255_s3 + $0xe0] sm:$0xff] %v1572_v55  ;;  %1764 = vst [vmem:[%s3255_s3 + $0x2e0] sm:$0xff] %v1636_v56  ;;  %v1573_v62 = vmax.f32 %v1149_v58, 0.0  ;;  %v1637_v63 = vmax.f32 %v1405_v59, 0.0 }
 0x173   :  { %1701 = vst [vmem:[%s3255_s3 + $0xe8] sm:$0xff] %v1573_v62  ;;  %1765 = vst [vmem:[%s3255_s3 + $0x2e8] sm:$0xff] %v1637_v63 }
 0x174   :  { %v1153_v0 = vpop.f32.mrb[60].mxu0  ;;  %v1409_v1 = vpop.f32.mrb[60].mxu1 }
 0x175   :  { %v1154_v2 = vadd.f32 %v2669_v57, %v1153_v0  ;;  %v1410_v3 = vadd.f32 %v2669_v57, %v1409_v1  ;;  %v1155_v4 = vpop.f32.mrb[61].mxu0  ;;  %v1411_v5 = vpop.f32.mrb[61].mxu1 }
 0x176   :  { %v1156_v6 = vpop.f32.mrb[62].mxu0  ;;  %v1412_v7 = vpop.f32.mrb[62].mxu1 }
 0x177   :  { %v1574_v8 = vmax.f32 %v1154_v2, 0.0  ;;  %v1638_v9 = vmax.f32 %v1410_v3, 0.0  ;;  %v1157_v10 = vadd.f32 %v2669_v57, %v1156_v6  ;;  %v1413_v11 = vadd.f32 %v2669_v57, %v1412_v7  ;;  %v1158_v12 = vpop.f32.mrb[63].mxu0  ;;  %v1414_v13 = vpop.f32.mrb[63].mxu1 }
 0x179   :  { %1702 = vst [vmem:[%s3255_s3 + $0xf0] sm:$0xff] %v1574_v8  ;;  %1766 = vst [vmem:[%s3255_s3 + $0x2f0] sm:$0xff] %v1638_v9  ;;  %v1575_v14 = vmax.f32 %v1157_v10, 0.0  ;;  %v1639_v15 = vmax.f32 %v1413_v11, 0.0 }
 0x17b   :  { %1703 = vst [vmem:[%s3255_s3 + $0xf8] sm:$0xff] %v1575_v14  ;;  %1767 = vst [vmem:[%s3255_s3 + $0x2f8] sm:$0xff] %v1639_v15 }
 0x17c   :  { %v1161_v16 = vpop.f32.mrb[64].mxu0  ;;  %v1417_v17 = vpop.f32.mrb[64].mxu1 }
 0x17d   :  { %v1162_v18 = vadd.f32 %v2669_v57, %v1161_v16  ;;  %v1418_v19 = vadd.f32 %v2669_v57, %v1417_v17  ;;  %v1163_v20 = vpop.f32.mrb[65].mxu0  ;;  %v1419_v21 = vpop.f32.mrb[65].mxu1 }
 0x17e   :  { %v1164_v22 = vpop.f32.mrb[66].mxu0  ;;  %v1420_v23 = vpop.f32.mrb[66].mxu1 }
 0x17f   :  { %v1576_v24 = vmax.f32 %v1162_v18, 0.0  ;;  %v1640_v25 = vmax.f32 %v1418_v19, 0.0  ;;  %v1165_v26 = vadd.f32 %v2669_v57, %v1164_v22  ;;  %v1421_v27 = vadd.f32 %v2669_v57, %v1420_v23  ;;  %v1166_v28 = vpop.f32.mrb[67].mxu0  ;;  %v1422_v29 = vpop.f32.mrb[67].mxu1 }
 0x181   :  { %1704 = vst [vmem:[%s3255_s3 + $0x100] sm:$0xff] %v1576_v24  ;;  %1768 = vst [vmem:[%s3255_s3 + $0x300] sm:$0xff] %v1640_v25  ;;  %v1577_v30 = vmax.f32 %v1165_v26, 0.0  ;;  %v1641_v31 = vmax.f32 %v1421_v27, 0.0 }
 0x183   :  { %1705 = vst [vmem:[%s3255_s3 + $0x108] sm:$0xff] %v1577_v30  ;;  %1769 = vst [vmem:[%s3255_s3 + $0x308] sm:$0xff] %v1641_v31 }
 0x184   :  { %v1169_v32 = vpop.f32.mrb[68].mxu0  ;;  %v1425_v33 = vpop.f32.mrb[68].mxu1 }
 0x185   :  { %v1170_v34 = vadd.f32 %v2669_v57, %v1169_v32  ;;  %v1426_v35 = vadd.f32 %v2669_v57, %v1425_v33  ;;  %v1171_v36 = vpop.f32.mrb[69].mxu0  ;;  %v1427_v37 = vpop.f32.mrb[69].mxu1 }
 0x186   :  { %v1172_v38 = vpop.f32.mrb[70].mxu0  ;;  %v1428_v39 = vpop.f32.mrb[70].mxu1 }
 0x187   :  { %v1578_v40 = vmax.f32 %v1170_v34, 0.0  ;;  %v1642_v41 = vmax.f32 %v1426_v35, 0.0  ;;  %v1173_v42 = vadd.f32 %v2669_v57, %v1172_v38  ;;  %v1429_v43 = vadd.f32 %v2669_v57, %v1428_v39  ;;  %v1174_v44 = vpop.f32.mrb[71].mxu0  ;;  %v1430_v45 = vpop.f32.mrb[71].mxu1 }
 0x189   :  { %1706 = vst [vmem:[%s3255_s3 + $0x110] sm:$0xff] %v1578_v40  ;;  %1770 = vst [vmem:[%s3255_s3 + $0x310] sm:$0xff] %v1642_v41  ;;  %v1579_v46 = vmax.f32 %v1173_v42, 0.0  ;;  %v1643_v47 = vmax.f32 %v1429_v43, 0.0 }
 0x18b   :  { %1707 = vst [vmem:[%s3255_s3 + $0x118] sm:$0xff] %v1579_v46  ;;  %1771 = vst [vmem:[%s3255_s3 + $0x318] sm:$0xff] %v1643_v47 }
 0x18c   :  { %v1177_v48 = vpop.f32.mrb[72].mxu0  ;;  %v1433_v49 = vpop.f32.mrb[72].mxu1 }
 0x18d   :  { %v1178_v50 = vadd.f32 %v2669_v57, %v1177_v48  ;;  %v1434_v51 = vadd.f32 %v2669_v57, %v1433_v49  ;;  %v1179_v52 = vpop.f32.mrb[73].mxu0  ;;  %v1435_v53 = vpop.f32.mrb[73].mxu1 }
 0x18e   :  { %v1180_v54 = vpop.f32.mrb[74].mxu0  ;;  %v1436_v55 = vpop.f32.mrb[74].mxu1 }
 0x18f   :  { %v1580_v56 = vmax.f32 %v1178_v50, 0.0  ;;  %v1644_v58 = vmax.f32 %v1434_v51, 0.0  ;;  %v1181_v59 = vadd.f32 %v2669_v57, %v1180_v54  ;;  %v1437_v60 = vadd.f32 %v2669_v57, %v1436_v55  ;;  %v1182_v61 = vpop.f32.mrb[75].mxu0  ;;  %v1438_v62 = vpop.f32.mrb[75].mxu1 }
 0x191   :  { %1708 = vst [vmem:[%s3255_s3 + $0x120] sm:$0xff] %v1580_v56  ;;  %1772 = vst [vmem:[%s3255_s3 + $0x320] sm:$0xff] %v1644_v58  ;;  %v1581_v63 = vmax.f32 %v1181_v59, 0.0  ;;  %v1645_v0 = vmax.f32 %v1437_v60, 0.0 }
 0x193   :  { %1709 = vst [vmem:[%s3255_s3 + $0x128] sm:$0xff] %v1581_v63  ;;  %1773 = vst [vmem:[%s3255_s3 + $0x328] sm:$0xff] %v1645_v0 }
 0x194   :  { %v1185_v1 = vpop.f32.mrb[76].mxu0  ;;  %v1441_v2 = vpop.f32.mrb[76].mxu1 }
 0x195   :  { %v1186_v3 = vadd.f32 %v2669_v57, %v1185_v1  ;;  %v1442_v4 = vadd.f32 %v2669_v57, %v1441_v2  ;;  %v1187_v5 = vpop.f32.mrb[77].mxu0  ;;  %v1443_v6 = vpop.f32.mrb[77].mxu1 }
 0x196   :  { %v1188_v7 = vpop.f32.mrb[78].mxu0  ;;  %v1444_v8 = vpop.f32.mrb[78].mxu1 }
 0x197   :  { %v1582_v9 = vmax.f32 %v1186_v3, 0.0  ;;  %v1646_v10 = vmax.f32 %v1442_v4, 0.0  ;;  %v1189_v11 = vadd.f32 %v2669_v57, %v1188_v7  ;;  %v1445_v12 = vadd.f32 %v2669_v57, %v1444_v8  ;;  %v1190_v13 = vpop.f32.mrb[79].mxu0  ;;  %v1446_v14 = vpop.f32.mrb[79].mxu1 }
 0x199   :  { %1710 = vst [vmem:[%s3255_s3 + $0x130] sm:$0xff] %v1582_v9  ;;  %1774 = vst [vmem:[%s3255_s3 + $0x330] sm:$0xff] %v1646_v10  ;;  %v1583_v15 = vmax.f32 %v1189_v11, 0.0  ;;  %v1647_v16 = vmax.f32 %v1445_v12, 0.0 }
 0x19b   :  { %1711 = vst [vmem:[%s3255_s3 + $0x138] sm:$0xff] %v1583_v15  ;;  %1775 = vst [vmem:[%s3255_s3 + $0x338] sm:$0xff] %v1647_v16 }
 0x19c   :  { %v1193_v17 = vpop.f32.mrb[80].mxu0  ;;  %v1449_v18 = vpop.f32.mrb[80].mxu1 }
 0x19d   :  { %v1194_v19 = vadd.f32 %v2669_v57, %v1193_v17  ;;  %v1450_v20 = vadd.f32 %v2669_v57, %v1449_v18  ;;  %v1195_v21 = vpop.f32.mrb[81].mxu0  ;;  %v1451_v22 = vpop.f32.mrb[81].mxu1 }
 0x19e   :  { %v1196_v23 = vpop.f32.mrb[82].mxu0  ;;  %v1452_v24 = vpop.f32.mrb[82].mxu1 }
 0x19f   :  { %v1584_v25 = vmax.f32 %v1194_v19, 0.0  ;;  %v1648_v26 = vmax.f32 %v1450_v20, 0.0  ;;  %v1197_v27 = vadd.f32 %v2669_v57, %v1196_v23  ;;  %v1453_v28 = vadd.f32 %v2669_v57, %v1452_v24  ;;  %v1198_v29 = vpop.f32.mrb[83].mxu0  ;;  %v1454_v30 = vpop.f32.mrb[83].mxu1  ;;  %v3122_v19 = vld [vmem:[%s3254_s2] ss:$0 sm:$0xff] }
 0x1a1   :  { %1712 = vst [vmem:[%s3255_s3 + $0x140] sm:$0xff] %v1584_v25  ;;  %1776 = vst [vmem:[%s3255_s3 + $0x340] sm:$0xff] %v1648_v26  ;;  %v1585_v31 = vmax.f32 %v1197_v27, 0.0  ;;  %v1649_v32 = vmax.f32 %v1453_v28, 0.0 }
 0x1a3   :  { %1713 = vst [vmem:[%s3255_s3 + $0x148] sm:$0xff] %v1585_v31  ;;  %1777 = vst [vmem:[%s3255_s3 + $0x348] sm:$0xff] %v1649_v32 }
 0x1a4   :  { %v1201_v33 = vpop.f32.mrb[84].mxu0  ;;  %v1457_v34 = vpop.f32.mrb[84].mxu1 }
 0x1a5   :  { %v1202_v35 = vadd.f32 %v2669_v57, %v1201_v33  ;;  %v1458_v36 = vadd.f32 %v2669_v57, %v1457_v34  ;;  %v1203_v37 = vpop.f32.mrb[85].mxu0  ;;  %v1459_v38 = vpop.f32.mrb[85].mxu1 }
 0x1a6   :  { %v1204_v39 = vpop.f32.mrb[86].mxu0  ;;  %v1460_v40 = vpop.f32.mrb[86].mxu1 }
 0x1a7   :  { %v1586_v41 = vmax.f32 %v1202_v35, 0.0  ;;  %v1650_v42 = vmax.f32 %v1458_v36, 0.0  ;;  %v1205_v43 = vadd.f32 %v2669_v57, %v1204_v39  ;;  %v1461_v44 = vadd.f32 %v2669_v57, %v1460_v40  ;;  %v1206_v45 = vpop.f32.mrb[87].mxu0  ;;  %v1462_v46 = vpop.f32.mrb[87].mxu1 }
 0x1a9   :  { %1714 = vst [vmem:[%s3255_s3 + $0x150] sm:$0xff] %v1586_v41  ;;  %1778 = vst [vmem:[%s3255_s3 + $0x350] sm:$0xff] %v1650_v42  ;;  %v1587_v47 = vmax.f32 %v1205_v43, 0.0  ;;  %v1651_v48 = vmax.f32 %v1461_v44, 0.0 }
 0x1ab   :  { %1715 = vst [vmem:[%s3255_s3 + $0x158] sm:$0xff] %v1587_v47  ;;  %1779 = vst [vmem:[%s3255_s3 + $0x358] sm:$0xff] %v1651_v48 }
 0x1ac   :  { %v1209_v49 = vpop.f32.mrb[88].mxu0  ;;  %v1465_v50 = vpop.f32.mrb[88].mxu1 }
 0x1ad   :  { %v1210_v51 = vadd.f32 %v2669_v57, %v1209_v49  ;;  %v1466_v52 = vadd.f32 %v2669_v57, %v1465_v50  ;;  %v1211_v53 = vpop.f32.mrb[89].mxu0  ;;  %v1467_v54 = vpop.f32.mrb[89].mxu1 }
 0x1ae   :  { %v1212_v55 = vpop.f32.mrb[90].mxu0  ;;  %v1468_v56 = vpop.f32.mrb[90].mxu1 }
 0x1af   :  { %v1588_v58 = vmax.f32 %v1210_v51, 0.0  ;;  %v1652_v59 = vmax.f32 %v1466_v52, 0.0  ;;  %v1213_v60 = vadd.f32 %v2669_v57, %v1212_v55  ;;  %v1469_v61 = vadd.f32 %v2669_v57, %v1468_v56  ;;  %v1214_v62 = vpop.f32.mrb[91].mxu0  ;;  %v1470_v63 = vpop.f32.mrb[91].mxu1 }
 0x1b1   :  { %1716 = vst [vmem:[%s3255_s3 + $0x160] sm:$0xff] %v1588_v58  ;;  %1780 = vst [vmem:[%s3255_s3 + $0x360] sm:$0xff] %v1652_v59  ;;  %v1589_v0 = vmax.f32 %v1213_v60, 0.0  ;;  %v1653_v1 = vmax.f32 %v1469_v61, 0.0 }
 0x1b3   :  { %1717 = vst [vmem:[%s3255_s3 + $0x168] sm:$0xff] %v1589_v0  ;;  %1781 = vst [vmem:[%s3255_s3 + $0x368] sm:$0xff] %v1653_v1 }
 0x1b4   :  { %v1217_v2 = vpop.f32.mrb[92].mxu0  ;;  %v1473_v3 = vpop.f32.mrb[92].mxu1 }
 0x1b5   :  { %v1218_v4 = vadd.f32 %v2669_v57, %v1217_v2  ;;  %v1474_v5 = vadd.f32 %v2669_v57, %v1473_v3  ;;  %v1219_v6 = vpop.f32.mrb[93].mxu0  ;;  %v1475_v7 = vpop.f32.mrb[93].mxu1 }
 0x1b6   :  { %v1220_v8 = vpop.f32.mrb[94].mxu0  ;;  %v1476_v9 = vpop.f32.mrb[94].mxu1 }
 0x1b7   :  { %v1590_v10 = vmax.f32 %v1218_v4, 0.0  ;;  %v1654_v11 = vmax.f32 %v1474_v5, 0.0  ;;  %v1221_v12 = vadd.f32 %v2669_v57, %v1220_v8  ;;  %v1477_v13 = vadd.f32 %v2669_v57, %v1476_v9  ;;  %v1222_v14 = vpop.f32.mrb[95].mxu0  ;;  %v1478_v15 = vpop.f32.mrb[95].mxu1 }
 0x1b9   :  { %1718 = vst [vmem:[%s3255_s3 + $0x170] sm:$0xff] %v1590_v10  ;;  %1782 = vst [vmem:[%s3255_s3 + $0x370] sm:$0xff] %v1654_v11  ;;  %v1591_v16 = vmax.f32 %v1221_v12, 0.0  ;;  %v1655_v17 = vmax.f32 %v1477_v13, 0.0 }
 0x1bb   :  { %1719 = vst [vmem:[%s3255_s3 + $0x178] sm:$0xff] %v1591_v16  ;;  %1783 = vst [vmem:[%s3255_s3 + $0x378] sm:$0xff] %v1655_v17 }
 0x1bc   :  { %v1225_v57 = vpop.f32.mrb[96].mxu0  ;;  %v1481_v18 = vpop.f32.mrb[96].mxu1 }
 0x1bd   :  { %v1226_v20 = vadd.f32 %v3122_v19, %v1225_v57  ;;  %v1482_v21 = vadd.f32 %v3122_v19, %v1481_v18  ;;  %v1227_v22 = vpop.f32.mrb[97].mxu0  ;;  %v1483_v23 = vpop.f32.mrb[97].mxu1 }
 0x1be   :  { %v1228_v24 = vpop.f32.mrb[98].mxu0  ;;  %v1484_v25 = vpop.f32.mrb[98].mxu1 }
 0x1bf   :  { %v1592_v26 = vmax.f32 %v1226_v20, 0.0  ;;  %v1656_v27 = vmax.f32 %v1482_v21, 0.0  ;;  %v1229_v28 = vadd.f32 %v3122_v19, %v1228_v24  ;;  %v1485_v29 = vadd.f32 %v3122_v19, %v1484_v25  ;;  %v1230_v30 = vpop.f32.mrb[99].mxu0  ;;  %v1486_v31 = vpop.f32.mrb[99].mxu1 }
 0x1c1   :  { %1720 = vst [vmem:[%s3255_s3 + $0x180] sm:$0xff] %v1592_v26  ;;  %1784 = vst [vmem:[%s3255_s3 + $0x380] sm:$0xff] %v1656_v27  ;;  %v1593_v32 = vmax.f32 %v1229_v28, 0.0  ;;  %v1657_v33 = vmax.f32 %v1485_v29, 0.0 }
 0x1c3   :  { %1721 = vst [vmem:[%s3255_s3 + $0x188] sm:$0xff] %v1593_v32  ;;  %1785 = vst [vmem:[%s3255_s3 + $0x388] sm:$0xff] %v1657_v33 }
 0x1c4   :  { %v1233_v34 = vpop.f32.mrb[100].mxu0  ;;  %v1489_v35 = vpop.f32.mrb[100].mxu1 }
 0x1c5   :  { %v1234_v36 = vadd.f32 %v3122_v19, %v1233_v34  ;;  %v1490_v37 = vadd.f32 %v3122_v19, %v1489_v35  ;;  %v1235_v38 = vpop.f32.mrb[101].mxu0  ;;  %v1491_v39 = vpop.f32.mrb[101].mxu1 }
 0x1c6   :  { %v1236_v40 = vpop.f32.mrb[102].mxu0  ;;  %v1492_v41 = vpop.f32.mrb[102].mxu1 }
 0x1c7   :  { %v1594_v42 = vmax.f32 %v1234_v36, 0.0  ;;  %v1658_v43 = vmax.f32 %v1490_v37, 0.0  ;;  %v1237_v44 = vadd.f32 %v3122_v19, %v1236_v40  ;;  %v1493_v45 = vadd.f32 %v3122_v19, %v1492_v41  ;;  %v1238_v46 = vpop.f32.mrb[103].mxu0  ;;  %v1494_v47 = vpop.f32.mrb[103].mxu1 }
 0x1c9   :  { %1722 = vst [vmem:[%s3255_s3 + $0x190] sm:$0xff] %v1594_v42  ;;  %1786 = vst [vmem:[%s3255_s3 + $0x390] sm:$0xff] %v1658_v43  ;;  %v1595_v48 = vmax.f32 %v1237_v44, 0.0  ;;  %v1659_v49 = vmax.f32 %v1493_v45, 0.0 }
 0x1cb   :  { %1723 = vst [vmem:[%s3255_s3 + $0x198] sm:$0xff] %v1595_v48  ;;  %1787 = vst [vmem:[%s3255_s3 + $0x398] sm:$0xff] %v1659_v49 }
 0x1cc   :  { %v1241_v50 = vpop.f32.mrb[104].mxu0  ;;  %v1497_v51 = vpop.f32.mrb[104].mxu1 }
 0x1cd   :  { %v1242_v52 = vadd.f32 %v3122_v19, %v1241_v50  ;;  %v1498_v53 = vadd.f32 %v3122_v19, %v1497_v51  ;;  %v1243_v54 = vpop.f32.mrb[105].mxu0  ;;  %v1499_v55 = vpop.f32.mrb[105].mxu1 }
 0x1ce   :  { %v1244_v56 = vpop.f32.mrb[106].mxu0  ;;  %v1500_v58 = vpop.f32.mrb[106].mxu1 }
 0x1cf   :  { %v1596_v59 = vmax.f32 %v1242_v52, 0.0  ;;  %v1660_v60 = vmax.f32 %v1498_v53, 0.0  ;;  %v1245_v61 = vadd.f32 %v3122_v19, %v1244_v56  ;;  %v1501_v62 = vadd.f32 %v3122_v19, %v1500_v58  ;;  %v1246_v63 = vpop.f32.mrb[107].mxu0  ;;  %v1502_v0 = vpop.f32.mrb[107].mxu1 }
 0x1d1   :  { %1724 = vst [vmem:[%s3255_s3 + $0x1a0] sm:$0xff] %v1596_v59  ;;  %1788 = vst [vmem:[%s3255_s3 + $0x3a0] sm:$0xff] %v1660_v60  ;;  %v1597_v1 = vmax.f32 %v1245_v61, 0.0  ;;  %v1661_v2 = vmax.f32 %v1501_v62, 0.0 }
 0x1d3   :  { %1725 = vst [vmem:[%s3255_s3 + $0x1a8] sm:$0xff] %v1597_v1  ;;  %1789 = vst [vmem:[%s3255_s3 + $0x3a8] sm:$0xff] %v1661_v2 }
 0x1d4   :  { %v1249_v3 = vpop.f32.mrb[108].mxu0  ;;  %v1505_v4 = vpop.f32.mrb[108].mxu1 }
 0x1d5   :  { %v1250_v5 = vadd.f32 %v3122_v19, %v1249_v3  ;;  %v1506_v6 = vadd.f32 %v3122_v19, %v1505_v4  ;;  %v1251_v7 = vpop.f32.mrb[109].mxu0  ;;  %v1507_v8 = vpop.f32.mrb[109].mxu1 }
 0x1d6   :  { %v1252_v9 = vpop.f32.mrb[110].mxu0  ;;  %v1508_v10 = vpop.f32.mrb[110].mxu1 }
 0x1d7   :  { %v1598_v11 = vmax.f32 %v1250_v5, 0.0  ;;  %v1662_v12 = vmax.f32 %v1506_v6, 0.0  ;;  %v1253_v13 = vadd.f32 %v3122_v19, %v1252_v9  ;;  %v1509_v14 = vadd.f32 %v3122_v19, %v1508_v10  ;;  %v1254_v15 = vpop.f32.mrb[111].mxu0  ;;  %v1510_v16 = vpop.f32.mrb[111].mxu1 }
 0x1d9   :  { %1726 = vst [vmem:[%s3255_s3 + $0x1b0] sm:$0xff] %v1598_v11  ;;  %1790 = vst [vmem:[%s3255_s3 + $0x3b0] sm:$0xff] %v1662_v12  ;;  %v1599_v17 = vmax.f32 %v1253_v13, 0.0  ;;  %v1663_v57 = vmax.f32 %v1509_v14, 0.0 }
 0x1db   :  { %1727 = vst [vmem:[%s3255_s3 + $0x1b8] sm:$0xff] %v1599_v17  ;;  %1791 = vst [vmem:[%s3255_s3 + $0x3b8] sm:$0xff] %v1663_v57 }
 0x1dc   :  { %v1257_v18 = vpop.f32.mrb[112].mxu0  ;;  %v1513_v20 = vpop.f32.mrb[112].mxu1 }
 0x1dd   :  { %v1258_v21 = vadd.f32 %v3122_v19, %v1257_v18  ;;  %v1514_v22 = vadd.f32 %v3122_v19, %v1513_v20  ;;  %v1259_v23 = vpop.f32.mrb[113].mxu0  ;;  %v1515_v24 = vpop.f32.mrb[113].mxu1 }
 0x1de   :  { %v1260_v25 = vpop.f32.mrb[114].mxu0  ;;  %v1516_v26 = vpop.f32.mrb[114].mxu1 }
 0x1df   :  { %v1600_v27 = vmax.f32 %v1258_v21, 0.0  ;;  %v1664_v28 = vmax.f32 %v1514_v22, 0.0  ;;  %v1261_v29 = vadd.f32 %v3122_v19, %v1260_v25  ;;  %v1517_v30 = vadd.f32 %v3122_v19, %v1516_v26  ;;  %v1262_v31 = vpop.f32.mrb[115].mxu0  ;;  %v1518_v32 = vpop.f32.mrb[115].mxu1 }
 0x1e1   :  { %1728 = vst [vmem:[%s3255_s3 + $0x1c0] sm:$0xff] %v1600_v27  ;;  %1792 = vst [vmem:[%s3255_s3 + $0x3c0] sm:$0xff] %v1664_v28  ;;  %v1601_v33 = vmax.f32 %v1261_v29, 0.0  ;;  %v1665_v34 = vmax.f32 %v1517_v30, 0.0 }
 0x1e3   :  { %1729 = vst [vmem:[%s3255_s3 + $0x1c8] sm:$0xff] %v1601_v33  ;;  %1793 = vst [vmem:[%s3255_s3 + $0x3c8] sm:$0xff] %v1665_v34 }
 0x1e4   :  { %v1265_v35 = vpop.f32.mrb[116].mxu0  ;;  %v1521_v36 = vpop.f32.mrb[116].mxu1 }
 0x1e5   :  { %v1266_v37 = vadd.f32 %v3122_v19, %v1265_v35  ;;  %v1522_v38 = vadd.f32 %v3122_v19, %v1521_v36  ;;  %v1267_v39 = vpop.f32.mrb[117].mxu0  ;;  %v1523_v40 = vpop.f32.mrb[117].mxu1 }
 0x1e6   :  { %v1268_v41 = vpop.f32.mrb[118].mxu0  ;;  %v1524_v42 = vpop.f32.mrb[118].mxu1 }
 0x1e7   :  { %v1602_v43 = vmax.f32 %v1266_v37, 0.0  ;;  %v1666_v44 = vmax.f32 %v1522_v38, 0.0  ;;  %v1269_v45 = vadd.f32 %v3122_v19, %v1268_v41  ;;  %v1525_v46 = vadd.f32 %v3122_v19, %v1524_v42  ;;  %v1270_v47 = vpop.f32.mrb[119].mxu0  ;;  %v1526_v48 = vpop.f32.mrb[119].mxu1 }
 0x1e9   :  { %1730 = vst [vmem:[%s3255_s3 + $0x1d0] sm:$0xff] %v1602_v43  ;;  %1794 = vst [vmem:[%s3255_s3 + $0x3d0] sm:$0xff] %v1666_v44  ;;  %v1603_v49 = vmax.f32 %v1269_v45, 0.0  ;;  %v1667_v50 = vmax.f32 %v1525_v46, 0.0 }
 0x1eb   :  { %1731 = vst [vmem:[%s3255_s3 + $0x1d8] sm:$0xff] %v1603_v49  ;;  %1795 = vst [vmem:[%s3255_s3 + $0x3d8] sm:$0xff] %v1667_v50 }
 0x1ec   :  { %v1273_v51 = vpop.f32.mrb[120].mxu0  ;;  %v1529_v52 = vpop.f32.mrb[120].mxu1 }
 0x1ed   :  { %v1274_v53 = vadd.f32 %v3122_v19, %v1273_v51  ;;  %v1530_v54 = vadd.f32 %v3122_v19, %v1529_v52  ;;  %v1275_v55 = vpop.f32.mrb[121].mxu0  ;;  %v1531_v56 = vpop.f32.mrb[121].mxu1 }
 0x1ee   :  { %v1276_v58 = vpop.f32.mrb[122].mxu0  ;;  %v1532_v59 = vpop.f32.mrb[122].mxu1 }
 0x1ef   :  { %v1604_v60 = vmax.f32 %v1274_v53, 0.0  ;;  %v1668_v61 = vmax.f32 %v1530_v54, 0.0  ;;  %v1277_v62 = vadd.f32 %v3122_v19, %v1276_v58  ;;  %v1533_v63 = vadd.f32 %v3122_v19, %v1532_v59  ;;  %v1278_v0 = vpop.f32.mrb[123].mxu0  ;;  %v1534_v1 = vpop.f32.mrb[123].mxu1 }
 0x1f1   :  { %1732 = vst [vmem:[%s3255_s3 + $0x1e0] sm:$0xff] %v1604_v60  ;;  %1796 = vst [vmem:[%s3255_s3 + $0x3e0] sm:$0xff] %v1668_v61  ;;  %v1605_v2 = vmax.f32 %v1277_v62, 0.0  ;;  %v1669_v3 = vmax.f32 %v1533_v63, 0.0 }
 0x1f3   :  { %1733 = vst [vmem:[%s3255_s3 + $0x1e8] sm:$0xff] %v1605_v2  ;;  %1797 = vst [vmem:[%s3255_s3 + $0x3e8] sm:$0xff] %v1669_v3 }
 0x1f4   :  { %v1281_v4 = vpop.f32.mrb[124].mxu0  ;;  %v1537_v5 = vpop.f32.mrb[124].mxu1 }
 0x1f5   :  { %v1282_v6 = vadd.f32 %v3122_v19, %v1281_v4  ;;  %v1538_v7 = vadd.f32 %v3122_v19, %v1537_v5  ;;  %v1283_v8 = vpop.f32.mrb[125].mxu0  ;;  %v1539_v9 = vpop.f32.mrb[125].mxu1 }
 0x1f6   :  { %v1284_v10 = vpop.f32.mrb[126].mxu0  ;;  %v1540_v11 = vpop.f32.mrb[126].mxu1 }
 0x1f7   :  { %v1606_v12 = vmax.f32 %v1282_v6, 0.0  ;;  %v1670_v13 = vmax.f32 %v1538_v7, 0.0  ;;  %v1285_v14 = vadd.f32 %v3122_v19, %v1284_v10  ;;  %v1541_v15 = vadd.f32 %v3122_v19, %v1540_v11  ;;  %v1286_v16 = vpop.f32.mrb[127].mxu0  ;;  %v1542_v17 = vpop.f32.mrb[127].mxu1 }
 0x1f9   :  { %1734 = vst [vmem:[%s3255_s3 + $0x1f0] sm:$0xff] %v1606_v12  ;;  %1798 = vst [vmem:[%s3255_s3 + $0x3f0] sm:$0xff] %v1670_v13  ;;  %v1607_v57 = vmax.f32 %v1285_v14, 0.0  ;;  %v1671_v18 = vmax.f32 %v1541_v15, 0.0 }
 0x1fb   :  { %1735 = vst [vmem:[%s3255_s3 + $0x1f8] sm:$0xff] %v1607_v57  ;;  %1799 = vst [vmem:[%s3255_s3 + $0x3f8] sm:$0xff] %v1671_v18 }

</bundles_post_ra>
